<compile_context>
chip_gen: v7x
topology: tpu7x:2x2x1
jax: 0.10.0
libtpu: 0.0.40
codegen_flags: <defaults>
</compile_context>

<pallas_src>
import jax
import jax.numpy as jnp
from jax.experimental import pallas as pl
from jax.experimental.pallas import tpu as pltpu


def _round_up(a, b):
    return ((a + b - 1) // b) * b


def _device_config():
    """(grid tiles, hidden-tanh dtype) picked from the local TPU generation."""
    try:
        dev = jax.devices()[0]
        kind = dev.device_kind.lower()
        platform = dev.platform.lower()
    except Exception:  # pragma: no cover
        return 1, jnp.float32
    if platform != "tpu":
        return 1, jnp.float32
    # 2 TensorCores per chip on v7x (and megacore v4/v5p); 1 on v5e/v6e/v2/v3.
    two_tc = any(t in kind for t in ("v7", "v4", "v5p"))
    # bf16 VPU/EUP exists on v6e/v7x; v5e would emulate bf16 elementwise (net loss).
    bf16_eup = any(t in kind for t in ("v6", "v7"))
    return (2 if two_tc else 1), (jnp.bfloat16 if bf16_eup else jnp.float32)


def make_actor_kernel(hidden_tanh_dtype):
    """Kernel factory; hidden_tanh_dtype = bf16 on v6e/v7x, f32 on v5e."""

    def actor_kernel(x_ref, w1_ref, b1_ref, w2_ref, b2_ref, w3_ref, b3_ref, mean_ref):
        def hidden(a_bf16, w_ref, b_ref):
            # bf16 MXU dot, f32 accumulate + bias; tanh in hidden_tanh_dtype; the
            # result is consumed by the next bf16 MXU dot.
            acc = jnp.dot(a_bf16, w_ref[...],
                          preferred_element_type=jnp.float32) + b_ref[...]
            return jnp.tanh(acc.astype(hidden_tanh_dtype)).astype(jnp.bfloat16)

        h1 = hidden(x_ref[...], w1_ref, b1_ref)        # fc1 + tanh
        h2 = hidden(h1, w2_ref, b2_ref)                # fc2 + tanh
        # fc3 + tanh: bias add + tanh stay in f32; lane-padded -> lane-dense store.
        mean = jnp.tanh(jnp.dot(h2, w3_ref[...],
                                preferred_element_type=jnp.float32) + b3_ref[...])
        mean_ref[...] = mean.astype(mean_ref.dtype)

    return actor_kernel


def prepare_input(x, n_in_pad):
    """One-time input prep: zero-pad n_in to the bf16 sublane multiple, cast bf16."""
    B, n_in = x.shape
    if n_in_pad != n_in:
        x = jnp.pad(x, ((0, 0), (0, n_in_pad - n_in)))
    return x.astype(jnp.bfloat16)


def actor_forward(x_prepped, params, *, tiles=None, hidden_tanh_dtype=None,
                  vmem_limit_bytes=8 * 1024 * 1024):
    """x_prepped: (B, n_in_pad) bf16 (see prepare_input).

    Returns the lane-padded mean buffer (B_pad, n_out_pad) f32; the consumer slices
    [:B, :n_out] and broadcasts sigma = -1 (kept out of the kernel's hot path)."""
    if tiles is None or hidden_tanh_dtype is None:
        auto_tiles, auto_dtype = _device_config()
        tiles = auto_tiles if tiles is None else tiles
        hidden_tanh_dtype = auto_dtype if hidden_tanh_dtype is None else hidden_tanh_dtype

    B, n_in_pad = x_prepped.shape
    n_mid = params["w1"].shape[1]
    n_pad = params["w3"].shape[1]            # lane-padded fc3 width (multiple of 128)

    # One batch tile per grid step; tile a multiple of 8 sublanes.  Arrange
    # B % (8*tiles) == 0 at the call site so the fallback pad below is never hit.
    tb = _round_up(max(1, (B + tiles - 1) // tiles), 8)
    B_pad = tb * tiles
    if B_pad != B:
        x_prepped = jnp.pad(x_prepped, ((0, B_pad - B), (0, 0)))

    resident = lambda i: (0, 0)              # constant index_map -> stays in VMEM

    out_pad = pl.pallas_call(
        make_actor_kernel(hidden_tanh_dtype),
        out_shape=jax.ShapeDtypeStruct((B_pad, n_pad), jnp.float32),
        grid=(B_pad // tb,),
        in_specs=[
            pl.BlockSpec((tb, n_in_pad), lambda i: (i, 0)),   # x tile (bf16)
            pl.BlockSpec((n_in_pad, n_mid), resident),        # w1 (bf16, rows padded)
            pl.BlockSpec((1, n_mid), resident),               # b1 (f32)
            pl.BlockSpec((n_mid, n_mid), resident),           # w2 (bf16)
            pl.BlockSpec((1, n_mid), resident),               # b2 (f32)
            pl.BlockSpec((n_mid, n_pad), resident),           # w3 padded (bf16)
            pl.BlockSpec((1, n_pad), resident),               # b3 padded (f32)
        ],
        out_specs=pl.BlockSpec((tb, n_pad), lambda i: (i, 0)),
        compiler_params=pltpu.CompilerParams(
            dimension_semantics=("parallel",),                # dual-TC split on v7x
            vmem_limit_bytes=vmem_limit_bytes,
        ),
    )(x_prepped, params["w1"], params["b1"], params["w2"], params["b2"],
      params["w3"], params["b3"])
    return out_pad


def actor_sample(key, mean, sigma):
    """get_action(): Normal(mean, exp(sigma)).sample(), then np.clip(-1, 1).

    Stochastic host/JAX-side step of the original forward; not part of the kernel."""
    eps = jax.random.normal(key, mean.shape, mean.dtype)
    return jnp.clip(mean + jnp.exp(sigma) * eps, -1.0, 1.0)


def init_actor_params(key, n_in, n_mid, n_out):
    """Mirror PyTorch init. Weights stored (in, out) in bf16; biases (1, out) f32.
    fc3 uses uniform_(-0.003, 0.003).  w1 rows padded to the bf16 sublane multiple,
    fc3 weight/bias lane-padded to a multiple of 128 output columns (with zeros)."""
    n_in_pad = _round_up(n_in, 16)           # bf16 sublane packing (16, 128)
    n_out_pad = _round_up(n_out, 128)

    def default_linear(k, fan_in, fan_out):
        kw, kb = jax.random.split(k)
        bound = 1.0 / jnp.sqrt(float(fan_in))
        w = jax.random.uniform(kw, (fan_in, fan_out), jnp.float32, -bound, bound)
        b = jax.random.uniform(kb, (1, fan_out), jnp.float32, -bound, bound)
        return w, b

    k1, k2, k3 = jax.random.split(key, 3)
    w1, b1 = default_linear(k1, n_in, n_mid)
    w2, b2 = default_linear(k2, n_mid, n_mid)
    kw3, kb3 = jax.random.split(k3)
    w3 = jax.random.uniform(kw3, (n_mid, n_out), jnp.float32, -0.003, 0.003)
    b3 = jax.random.uniform(kb3, (1, n_out), jnp.float32, -0.003, 0.003)

    w1 = jnp.pad(w1, ((0, n_in_pad - n_in), (0, 0)))          # zero rows: no effect
    w3 = jnp.pad(w3, ((0, 0), (0, n_out_pad - n_out)))        # zero cols: sliced off
    b3 = jnp.pad(b3, ((0, 0), (0, n_out_pad - n_out)))
    return {
        "w1": w1.astype(jnp.bfloat16), "b1": b1,
        "w2": w2.astype(jnp.bfloat16), "b2": b2,
        "w3": w3.astype(jnp.bfloat16), "b3": b3,
    }


def actor_reference(x_prepped, params, hidden_tanh_dtype):
    """Pure-JAX reference with the same precision recipe as the kernel."""
    def hidden(a, w, b):
        acc = jnp.dot(a, w, preferred_element_type=jnp.float32) + b
        return jnp.tanh(acc.astype(hidden_tanh_dtype)).astype(jnp.bfloat16)

    h1 = hidden(x_prepped, params["w1"], params["b1"])
    h2 = hidden(h1, params["w2"], params["b2"])
    mean = jnp.tanh(jnp.dot(h2, params["w3"],
                            preferred_element_type=jnp.float32) + params["b3"])
    return mean                                               # lane-padded (B, 128)


if __name__ == "__main__":
    # Hopper: obs dim 11, hidden 256 (per play()), action dim 3.
    # B=256 is a multiple of 8*tiles for both the 1-tile and 2-tile configurations.
    B, n_in, n_mid, n_out = 256, 11, 256, 3

    key = jax.random.PRNGKey(0)
    kx, kp, ks = jax.random.split(key, 3)
    x = jax.random.normal(kx, (B, n_in), jnp.float32)
    params = init_actor_params(kp, n_in, n_mid, n_out)

    tiles, hidden_tanh_dtype = _device_config()
    x_prepped = prepare_input(x, n_in_pad=params["w1"].shape[0])   # one-time prep

    mean_pad = actor_forward(x_prepped, params, tiles=tiles,
                             hidden_tanh_dtype=hidden_tanh_dtype)
    mean_pad = jax.block_until_ready(mean_pad)

    # Consumer-side (cheap) post-processing: slice real columns, broadcast sigma.
    mean = mean_pad[:B, :n_out]
    sigma = jnp.broadcast_to(jnp.float32(-1.0), mean.shape)   # sigma = [-1].expand_as

    mean_ref = actor_reference(x_prepped, params, hidden_tanh_dtype)[:B, :n_out]
    assert mean.shape == (B, n_out), mean.shape
    assert sigma.shape == (B, n_out), sigma.shape
    assert bool(jnp.all(sigma == -1.0)), "sigma must be the constant -1 tensor"
    # 2e-3 tolerance: Mosaic's bf16 EUP tanh on hidden layers may round differently
    # than XLA's; the final tanh / bias are f32 in both so the drift stays tiny.
    assert jnp.allclose(mean, mean_ref, atol=2e-3, rtol=2e-3), "mismatch vs reference"
    assert bool(jnp.all(jnp.abs(mean) <= 1.0)), "tanh output out of range"

    # Stochastic action sampling (outside the kernel), as in forward(play=False).
    actions = actor_sample(ks, mean, sigma)
    actions = jax.block_until_ready(actions)
    assert actions.shape == (B, n_out)
    assert bool(jnp.all(jnp.abs(actions) <= 1.0))

    print("KERNEL_OK")
</pallas_src>

<mosaic_0001>
module attributes {stable_mosaic.version = 11 : i64} {
  func.func @actor_kernel(%arg0: i32, %arg1: memref<256x16xbf16, #tpu.memory_space<vmem>>, %arg2: memref<16x256xbf16, #tpu.memory_space<vmem>>, %arg3: memref<1x256xf32, #tpu.memory_space<vmem>>, %arg4: memref<256x256xbf16, #tpu.memory_space<vmem>>, %arg5: memref<1x256xf32, #tpu.memory_space<vmem>>, %arg6: memref<256x128xbf16, #tpu.memory_space<vmem>>, %arg7: memref<1x128xf32, #tpu.memory_space<vmem>>, %arg8: memref<256x128xf32, #tpu.memory_space<vmem>>) attributes {dimension_semantics = [#tpu.dimension_semantics<parallel>], iteration_bounds = array<i64: 1>, scalar_prefetch = 0 : i64, scratch_operands = 0 : i64, tpu.core_type = #tpu.core_type<tc>, window_params = [{transform_indices = @transform_0, window_bounds = array<i64: 256, 16>}, {pipeline_mode = #tpu.pipeline_mode<synchronous>, transform_indices = @transform_1, window_bounds = array<i64: 16, 256>}, {pipeline_mode = #tpu.pipeline_mode<synchronous>, transform_indices = @transform_2, window_bounds = array<i64: 1, 256>}, {pipeline_mode = #tpu.pipeline_mode<synchronous>, transform_indices = @transform_3, window_bounds = array<i64: 256, 256>}, {pipeline_mode = #tpu.pipeline_mode<synchronous>, transform_indices = @transform_4, window_bounds = array<i64: 1, 256>}, {pipeline_mode = #tpu.pipeline_mode<synchronous>, transform_indices = @transform_5, window_bounds = array<i64: 256, 128>}, {pipeline_mode = #tpu.pipeline_mode<synchronous>, transform_indices = @transform_6, window_bounds = array<i64: 1, 128>}, {transform_indices = @transform_7, window_bounds = array<i64: 256, 128>}]} {
    %c0 = arith.constant 0 : index
    %c0_0 = arith.constant 0 : index
    %0 = vector.load %arg1[%c0, %c0_0] : memref<256x16xbf16, #tpu.memory_space<vmem>>, vector<256x16xbf16>
    %c0_1 = arith.constant 0 : index
    %c0_2 = arith.constant 0 : index
    %1 = vector.load %arg2[%c0_1, %c0_2] : memref<16x256xbf16, #tpu.memory_space<vmem>>, vector<16x256xbf16>
    %cst = arith.constant dense<0.000000e+00> : vector<256x256xf32>
    %2 = tpu.matmul %0, %1, %cst {dimension_numbers = #tpu.dot_dimension_numbers<[1], [0], [0], [1], [0, 0, 1, 1], [], []>} : vector<256x16xbf16>, vector<16x256xbf16>, vector<256x256xf32> -> vector<256x256xf32>
    %c0_3 = arith.constant 0 : index
    %c0_4 = arith.constant 0 : index
    %3 = vector.load %arg3[%c0_3, %c0_4] : memref<1x256xf32, #tpu.memory_space<vmem>>, vector<1x256xf32>
    %4 = vector.broadcast %3 : vector<1x256xf32> to vector<256x256xf32>
    %5 = arith.addf %2, %4 : vector<256x256xf32>
    %6 = math.tanh %5 : vector<256x256xf32>
    %7 = arith.truncf %6 : vector<256x256xf32> to vector<256x256xbf16>
    %c0_5 = arith.constant 0 : index
    %c0_6 = arith.constant 0 : index
    %8 = vector.load %arg4[%c0_5, %c0_6] : memref<256x256xbf16, #tpu.memory_space<vmem>>, vector<256x256xbf16>
    %cst_7 = arith.constant dense<0.000000e+00> : vector<256x256xf32>
    %9 = tpu.matmul %7, %8, %cst_7 {dimension_numbers = #tpu.dot_dimension_numbers<[1], [0], [0], [1], [0, 0, 1, 1], [], []>} : vector<256x256xbf16>, vector<256x256xbf16>, vector<256x256xf32> -> vector<256x256xf32>
    %c0_8 = arith.constant 0 : index
    %c0_9 = arith.constant 0 : index
    %10 = vector.load %arg5[%c0_8, %c0_9] : memref<1x256xf32, #tpu.memory_space<vmem>>, vector<1x256xf32>
    %11 = vector.broadcast %10 : vector<1x256xf32> to vector<256x256xf32>
    %12 = arith.addf %9, %11 : vector<256x256xf32>
    %13 = math.tanh %12 : vector<256x256xf32>
    %14 = arith.truncf %13 : vector<256x256xf32> to vector<256x256xbf16>
    %c0_10 = arith.constant 0 : index
    %c0_11 = arith.constant 0 : index
    %15 = vector.load %arg6[%c0_10, %c0_11] : memref<256x128xbf16, #tpu.memory_space<vmem>>, vector<256x128xbf16>
    %cst_12 = arith.constant dense<0.000000e+00> : vector<256x128xf32>
    %16 = tpu.matmul %14, %15, %cst_12 {dimension_numbers = #tpu.dot_dimension_numbers<[1], [0], [0], [1], [0, 0, 1, 1], [], []>} : vector<256x256xbf16>, vector<256x128xbf16>, vector<256x128xf32> -> vector<256x128xf32>
    %c0_13 = arith.constant 0 : index
    %c0_14 = arith.constant 0 : index
    %17 = vector.load %arg7[%c0_13, %c0_14] : memref<1x128xf32, #tpu.memory_space<vmem>>, vector<1x128xf32>
    %18 = vector.broadcast %17 : vector<1x128xf32> to vector<256x128xf32>
    %19 = arith.addf %16, %18 : vector<256x128xf32>
    %20 = math.tanh %19 : vector<256x128xf32>
    %c0_15 = arith.constant 0 : index
    %c0_16 = arith.constant 0 : index
    %21 = vector.load %arg8[%c0_15, %c0_16] : memref<256x128xf32, #tpu.memory_space<vmem>>, vector<256x128xf32>
    tpu.vector_store %arg8[%c0_15, %c0_16], %20 {strides = array<i32>} : memref<256x128xf32, #tpu.memory_space<vmem>>, vector<256x128xf32>,
    return
  }
  func.func @transform_0(%arg0: i32) -> (i32, i32) {
    %c0_i32 = arith.constant 0 : i32
    %c0_i32_0 = arith.constant 0 : i32
    return %arg0, %c0_i32 : i32, i32
  }
  func.func @transform_1(%arg0: i32) -> (i32, i32) {
    %c0_i32 = arith.constant 0 : i32
    %c0_i32_0 = arith.constant 0 : i32
    %c0_i32_1 = arith.constant 0 : i32
    return %c0_i32, %c0_i32_0 : i32, i32
  }
  func.func @transform_2(%arg0: i32) -> (i32, i32) {
    %c0_i32 = arith.constant 0 : i32
    %c0_i32_0 = arith.constant 0 : i32
    %c0_i32_1 = arith.constant 0 : i32
    return %c0_i32, %c0_i32_0 : i32, i32
  }
  func.func @transform_3(%arg0: i32) -> (i32, i32) {
    %c0_i32 = arith.constant 0 : i32
    %c0_i32_0 = arith.constant 0 : i32
    %c0_i32_1 = arith.constant 0 : i32
    return %c0_i32, %c0_i32_0 : i32, i32
  }
  func.func @transform_4(%arg0: i32) -> (i32, i32) {
    %c0_i32 = arith.constant 0 : i32
    %c0_i32_0 = arith.constant 0 : i32
    %c0_i32_1 = arith.constant 0 : i32
    return %c0_i32, %c0_i32_0 : i32, i32
  }
  func.func @transform_5(%arg0: i32) -> (i32, i32) {
    %c0_i32 = arith.constant 0 : i32
    %c0_i32_0 = arith.constant 0 : i32
    %c0_i32_1 = arith.constant 0 : i32
    return %c0_i32, %c0_i32_0 : i32, i32
  }
  func.func @transform_6(%arg0: i32) -> (i32, i32) {
    %c0_i32 = arith.constant 0 : i32
    %c0_i32_0 = arith.constant 0 : i32
    %c0_i32_1 = arith.constant 0 : i32
    return %c0_i32, %c0_i32_0 : i32, i32
  }
  func.func @transform_7(%arg0: i32) -> (i32, i32) {
    %c0_i32 = arith.constant 0 : i32
    %c0_i32_0 = arith.constant 0 : i32
    return %arg0, %c0_i32 : i32, i32
  }
}

</mosaic_0001>

<bundles_post_ra>
// kernel: tpu_custom_call.1
= control target key start
LH: loop header
LB: loop body
LE: loop exit
PB: predicated region body
PF: predicated region fallthrough
CT: control target
= control target key end

     0   :  { %12 = vsyncpa [#allocation3], 0  ;;  %s2532_s0 = inlined_call_operand.vmem [shape: bf16[256,16], index: 0, kind: input, shape index: {}]   ;;  %s2533_s1 = inlined_call_operand.vmem [shape: bf16[16,256], index: 1, kind: input, shape index: {}]   ;;  %s2534_s2 = inlined_call_operand.vmem [shape: f32[1,256], index: 2, kind: input, shape index: {}]   ;;  %s2535_s3 = inlined_call_operand.hbm [shape: bf16[256,256], index: 3, kind: input, shape index: {}]   ;;  %s2536_s4 = inlined_call_operand.vmem [shape: f32[1,256], index: 4, kind: input, shape index: {}]   ;;  %s2537_s5 = inlined_call_operand.vmem [shape: bf16[256,128], index: 5, kind: input, shape index: {}]   ;;  %s2538_s6 = inlined_call_operand.vmem [shape: f32[1,128], index: 6, kind: input, shape index: {}]   ;;  %s2539_s7 = inlined_call_operand.hbm [shape: f32[256,128], index: 7, kind: output, shape index: {}]  }
   0x1   :  { %13 = vsyncpa [#allocation4], 0  ;;  %s2039_s24 = smov [#allocation2]   ;;  %s1991_s28 = scalar_lea.hbm %s2535_s3, 4096 }
   0x2   :  { %s25_s25 = sshll.u32 %s2039_s24, 4  ;;  %p1992_p0 = scmp.ne.s32.totalorder %s2535_s3, %s1991_s28  ;;  %s26_s25 = int_to_ptr.vmem [resolvable:$true] %s25_s25 }
   0x3   :  { %p1995_p1 = scmp.lt.u32.totalorder %s1991_s28, %s2535_s3 }
   0x5   :  { %p1997_p2 = pnand %p1995_p1, %p1992_p0 }
   0x7   :  { %2000 = shalt.err (!%p1997_p2)
}
   0x8   :  { %s2001_s10 = scalar_lea.vmem %s26_s25, 4096  ;;  %p2006_p4 = scmp.lt.s32.totalorder %s26_s25, %s26_s25 }
   0x9   :  { %p2002_p3 = scmp.ne.s32.totalorder %s26_s25, %s2001_s10  ;;  %p2007_p5 = scmp.lt.s32.totalorder %s2001_s10, %s2001_s10 }
   0xb   :  { %p2008_p6 = por %p2007_p5, %p2006_p4 }
   0xd   :  { %p2009_p7 = pnand %p2008_p6, %p2002_p3 }
   0xf   :  { %2012 = shalt.err (!%p2009_p7)
}
  0x10   :  { %s2040_s11 = smov 128   ;;  %s2041_s12 = smov 8  }
  0x11   :  { %31 = dma.hbm_to_vmem [thread:$0]  %s2535_s3, 4096, %s26_s25, [#allocation3], %s2040_s11, %s2040_s11, %s2041_s12  }
  0x12   :  { %2035 = dma.done.wait [#allocation3], 4096  }
  0x13   :  { %2036 = vsyncadd [#allocation3], 4294963200  ;;  %v2042_v0 = vmov 0   ;;  %v1588_v1 = vld [vmem:[%s2533_s1 + $0x4] ss:$8 sps:$4 sm:$0xff]   ;;  %vm178_vm0 = vcmask 130048   ;;  %v78_v51 = vlaneseq }
  0x14   :  { %259 = vmatprep.mubr.bf16.mxu0 %v2042_v0  ;;  %339 = vmatprep.mubr.bf16.mxu1 %v2042_v0  ;;  %v1590_v2 = vld [vmem:[%s2533_s1] ss:$8 sps:$4 sm:$0xff]   ;;  %v1593_v7 = vld [vmem:[%s2532_s0 + $0x10] sm:$0xff]   ;;  %v1609_v9 = vld [vmem:[#allocation2 + $0x4] ss:$8 sps:$4 sm:$0xff]  }
  0x15   :  { %227 = vmatprep.subr.bf16.mxu0 %v1588_v1  ;;  %v1591_v3 = vld [vmem:[%s2532_s0] sm:$0xff]   ;;  %1581 = vmatprep.subr.bf16.mxu1 %v1588_v1  ;;  %v1592_v4 = vld [vmem:[%s2532_s0 + $0x8] sm:$0xff]   ;;  %v1612_v10 = vld [vmem:[#allocation2 + $0x14] ss:$8 sps:$4 sm:$0xff]   ;;  %v2185_v52 = vshrl.u32 %v78_v51, 7 }
  0x16   :  { %228 = vmatpush1.bf16.msra.mxu0 %v1590_v2  ;;  %1582 = vmatpush1.bf16.msra.mxu1 %v1590_v2  ;;  %v1599_v5 = vld [vmem:[%s2532_s0 + $0x40] sm:$0xff]   ;;  %v1600_v6 = vld [vmem:[%s2532_s0 + $0x48] sm:$0xff]   ;;  %v1610_v11 = vld [vmem:[#allocation2 + $0x10] ss:$8 sps:$4 sm:$0xff]  }
  0x17   :  { %v1607_v8 = vld [vmem:[#allocation2] ss:$8 sps:$4 sm:$0xff]   ;;  %720 = vmatprep.subr.bf16.mxu1 %v1609_v9  ;;  %v1615_v12 = vld [vmem:[#allocation2 + $0x24] ss:$8 sps:$4 sm:$0xff]   ;;  %v1601_v13 = vld [vmem:[%s2532_s0 + $0x50] sm:$0xff]   ;;  %v80_v53 = vsub.s32 0, %v2185_v52 }
  0x18   :  { %v1613_v14 = vld [vmem:[#allocation2 + $0x20] ss:$8 sps:$4 sm:$0xff]   ;;  %v1594_v15 = vld [vmem:[%s2532_s0 + $0x18] sm:$0xff]   ;;  %v1621_v18 = vld [vmem:[#allocation2 + $0x44] ss:$8 sps:$4 sm:$0xff]   ;;  %v84_v55 = vsub.s32 1, %v2185_v52 }
  0x19   :  { %1404 = vmatmul.mubr.msk.bf16.vlgmr.msra.gmra.mrb[0].mxu0 %vm178_vm0, %v1591_v3  ;;  %1412 = vmatmul.mubr.msk.bf16.vlgmr.msra.gmra.mrb[0].mxu1 %vm178_vm0, %v1599_v5  ;;  %v1618_v16 = vld [vmem:[#allocation2 + $0x34] ss:$8 sps:$4 sm:$0xff]   ;;  %v1616_v17 = vld [vmem:[#allocation2 + $0x30] ss:$8 sps:$4 sm:$0xff]   ;;  %v1595_v19 = vld [vmem:[%s2532_s0 + $0x20] sm:$0xff]  }
  0x1a   :  { %269 = vmatprep.mubr.bf16.mxu0 %v2042_v0  ;;  %349 = vmatprep.mubr.bf16.mxu1 %v2042_v0  ;;  %v1602_v20 = vld [vmem:[%s2532_s0 + $0x58] sm:$0xff]   ;;  %v1619_v21 = vld [vmem:[#allocation2 + $0x40] ss:$8 sps:$4 sm:$0xff]   ;;  %v1627_v24 = vld [vmem:[#allocation2 + $0x64] ss:$8 sps:$4 sm:$0xff]  }
  0x1b   :  { %721 = vmatpush1.bf16.msra.mxu1 %v1607_v8  ;;  %v1624_v22 = vld [vmem:[#allocation2 + $0x54] ss:$8 sps:$4 sm:$0xff]   ;;  %v1622_v23 = vld [vmem:[#allocation2 + $0x50] ss:$8 sps:$4 sm:$0xff]   ;;  %v1603_v25 = vld [vmem:[%s2532_s0 + $0x60] sm:$0xff]  }
  0x1c   :  { %722 = vmatprep.subr.bf16.mxu1 %v1612_v10  ;;  %v1625_v26 = vld [vmem:[#allocation2 + $0x60] ss:$8 sps:$4 sm:$0xff]   ;;  %v1630_v28 = vld [vmem:[#allocation2 + $0x74] ss:$8 sps:$4 sm:$0xff]   ;;  %v1628_v29 = vld [vmem:[#allocation2 + $0x70] ss:$8 sps:$4 sm:$0xff]  }
  0x1d   :  { %v1596_v27 = vld [vmem:[%s2532_s0 + $0x28] sm:$0xff]   ;;  %v1597_v33 = vld [vmem:[%s2532_s0 + $0x30] sm:$0xff]   ;;  %v1598_v39 = vld [vmem:[%s2532_s0 + $0x38] sm:$0xff]  }
  0x1e   :  { %v1633_v30 = vld [vmem:[#allocation2 + $0x84] ss:$8 sps:$4 sm:$0xff]   ;;  %v1631_v32 = vld [vmem:[#allocation2 + $0x80] ss:$8 sps:$4 sm:$0xff]   ;;  %v1636_v34 = vld [vmem:[#allocation2 + $0x94] ss:$8 sps:$4 sm:$0xff]  }
  0x1f   :  { %723 = vmatpush1.bf16.msra.mxu1 %v1610_v11  ;;  %v1604_v31 = vld [vmem:[%s2532_s0 + $0x68] sm:$0xff]   ;;  %v1634_v35 = vld [vmem:[#allocation2 + $0x90] ss:$8 sps:$4 sm:$0xff]   ;;  %v1642_v40 = vld [vmem:[#allocation2 + $0xb4] ss:$8 sps:$4 sm:$0xff]  }
  0x20   :  { %724 = vmatprep.subr.bf16.mxu1 %v1615_v12  ;;  %v1639_v36 = vld [vmem:[#allocation2 + $0xa4] ss:$8 sps:$4 sm:$0xff]   ;;  %v1605_v37 = vld [vmem:[%s2532_s0 + $0x70] sm:$0xff]   ;;  %v1637_v38 = vld [vmem:[#allocation2 + $0xa0] ss:$8 sps:$4 sm:$0xff]  }
  0x21   :  { %1405 = vmatmul.mubr.msk.bf16.gmra.mrb[4].mxu0 %vm178_vm0, %v1592_v4  ;;  %1413 = vmatmul.mubr.msk.bf16.gmra.mrb[4].mxu1 %vm178_vm0, %v1600_v6  ;;  %v1640_v41 = vld [vmem:[#allocation2 + $0xb0] ss:$8 sps:$4 sm:$0xff]   ;;  %v1645_v43 = vld [vmem:[#allocation2 + $0xc4] ss:$8 sps:$4 sm:$0xff]   ;;  %v1643_v44 = vld [vmem:[#allocation2 + $0xc0] ss:$8 sps:$4 sm:$0xff]  }
  0x22   :  { %279 = vmatprep.mubr.bf16.mxu0 %v2042_v0  ;;  %359 = vmatprep.mubr.bf16.mxu1 %v2042_v0  ;;  %v1606_v42 = vld [vmem:[%s2532_s0 + $0x78] sm:$0xff]   ;;  %v1651_v47 = vld [vmem:[#allocation2 + $0xe4] ss:$8 sps:$4 sm:$0xff]   ;;  %v1649_v48 = vld [vmem:[#allocation2 + $0xe0] ss:$8 sps:$4 sm:$0xff]  }
  0x23   :  { %725 = vmatpush1.bf16.msra.mxu1 %v1613_v14  ;;  %v1646_v45 = vld [vmem:[#allocation2 + $0xd0] ss:$8 sps:$4 sm:$0xff]   ;;  %v1648_v46 = vld [vmem:[#allocation2 + $0xd4] ss:$8 sps:$4 sm:$0xff]   ;;  %v76_v54 = vld [vmem:[%s2534_s2] sm:$0x3] }
  0x24   :  { %726 = vmatprep.subr.bf16.mxu1 %v1618_v16  ;;  %v1652_v49 = vld [vmem:[#allocation2 + $0xf0] ss:$8 sps:$4 sm:$0xff]   ;;  %v1654_v50 = vld [vmem:[#allocation2 + $0xf4] ss:$8 sps:$4 sm:$0xff]   ;;  %v2194_v56 = vrot.slane %v76_v54, %v80_v53  ;;  %v2198_v57 = vrot.slane %v76_v54, %v84_v55 }
  0x27   :  { %727 = vmatpush1.bf16.msra.mxu1 %v1616_v17 }
  0x28   :  { %728 = vmatprep.subr.bf16.mxu1 %v1621_v18  ;;  %v1655_v18 = vld [vmem:[%s2537_s5 + $0x40] sm:$0xff]  }
  0x29   :  { %1406 = vmatmul.mubr.msk.bf16.gmra.mrb[8].mxu0 %vm178_vm0, %v1593_v7  ;;  %1414 = vmatmul.mubr.msk.bf16.gmra.mrb[8].mxu1 %vm178_vm0, %v1601_v13 }
  0x2a   :  { %289 = vmatprep.mubr.bf16.mxu0 %v2042_v0  ;;  %369 = vmatprep.mubr.bf16.mxu1 %v2042_v0 }
  0x2b   :  { %729 = vmatpush1.bf16.msra.mxu1 %v1619_v21  ;;  %1469 = vmatprep.subr.bf16.mxu0 %v1655_v18  ;;  %v1664_v18 = vld [vmem:[%s2537_s5 + $0x20] sm:$0xff]  }
  0x2c   :  { %730 = vmatprep.subr.bf16.mxu1 %v1624_v22 }
  0x2f   :  { %731 = vmatpush1.bf16.msra.mxu1 %v1622_v23 }
  0x30   :  { %732 = vmatprep.subr.bf16.mxu1 %v1627_v24 }
  0x31   :  { %1407 = vmatmul.mubr.msk.bf16.gmra.mrb[12].mxu0 %vm178_vm0, %v1594_v15  ;;  %1415 = vmatmul.mubr.msk.bf16.gmra.mrb[12].mxu1 %vm178_vm0, %v1602_v20  ;;  %v1657_v20 = vld [vmem:[%s2537_s5 + $0x48] sm:$0xff]  }
  0x32   :  { %299 = vmatprep.mubr.bf16.mxu0 %v2042_v0  ;;  %379 = vmatprep.mubr.bf16.mxu1 %v2042_v0 }
  0x33   :  { %733 = vmatpush1.bf16.msra.mxu1 %v1625_v26 }
  0x34   :  { %734 = vmatprep.subr.bf16.mxu1 %v1630_v28 }
  0x37   :  { %735 = vmatpush1.bf16.msra.mxu1 %v1628_v29 }
  0x38   :  { %736 = vmatprep.subr.bf16.mxu1 %v1633_v30 }
  0x39   :  { %1408 = vmatmul.mubr.msk.bf16.gmra.mrb[16].mxu0 %vm178_vm0, %v1595_v19  ;;  %1416 = vmatmul.mubr.msk.bf16.gmra.mrb[16].mxu1 %vm178_vm0, %v1603_v25  ;;  %v1656_v19 = vld [vmem:[%s2537_s5] sm:$0xff]  }
  0x3a   :  { %309 = vmatprep.mubr.bf16.mxu0 %v2042_v0  ;;  %389 = vmatprep.mubr.bf16.mxu1 %v2042_v0 }
  0x3b   :  { %737 = vmatpush1.bf16.msra.mxu1 %v1631_v32  ;;  %1470 = vmatpush3.bf16.msra.mxu0 %v1656_v19 }
  0x3c   :  { %738 = vmatprep.subr.bf16.mxu1 %v1636_v34  ;;  %1471 = vmatprep.subr.bf16.mxu0 %v1657_v20 }
  0x3f   :  { %739 = vmatpush1.bf16.msra.mxu1 %v1634_v35 }
  0x40   :  { %740 = vmatprep.subr.bf16.mxu1 %v1639_v36 }
  0x41   :  { %1409 = vmatmul.mubr.msk.bf16.gmra.mrb[20].mxu0 %vm178_vm0, %v1596_v27  ;;  %1417 = vmatmul.mubr.msk.bf16.gmra.mrb[20].mxu1 %vm178_vm0, %v1604_v31  ;;  %v1658_v27 = vld [vmem:[%s2537_s5 + $0x8] sm:$0xff]  }
  0x42   :  { %319 = vmatprep.mubr.bf16.mxu0 %v2042_v0  ;;  %399 = vmatprep.mubr.bf16.mxu1 %v2042_v0 }
  0x43   :  { %741 = vmatpush1.bf16.msra.mxu1 %v1637_v38  ;;  %1472 = vmatpush3.bf16.msra.mxu0 %v1658_v27 }
  0x44   :  { %742 = vmatprep.subr.bf16.mxu1 %v1642_v40 }
  0x47   :  { %743 = vmatpush1.bf16.msra.mxu1 %v1640_v41 }
  0x48   :  { %744 = vmatprep.subr.bf16.mxu1 %v1645_v43 }
  0x49   :  { %1410 = vmatmul.mubr.msk.bf16.gmra.mrb[24].mxu0 %vm178_vm0, %v1597_v33  ;;  %1418 = vmatmul.mubr.msk.bf16.gmra.mrb[24].mxu1 %vm178_vm0, %v1605_v37  ;;  %v1659_v33 = vld [vmem:[%s2537_s5 + $0x50] sm:$0xff]  }
  0x4a   :  { %329 = vmatprep.mubr.bf16.mxu0 %v2042_v0  ;;  %409 = vmatprep.mubr.bf16.mxu1 %v2042_v0 }
  0x4b   :  { %745 = vmatpush1.bf16.msra.mxu1 %v1643_v44  ;;  %1473 = vmatprep.subr.bf16.mxu0 %v1659_v33 }
  0x4c   :  { %746 = vmatprep.subr.bf16.mxu1 %v1648_v46 }
  0x4f   :  { %747 = vmatpush1.bf16.msra.mxu1 %v1646_v45  ;;  %v1660_v45 = vld [vmem:[%s2537_s5 + $0x10] sm:$0xff]  }
  0x50   :  { %748 = vmatprep.subr.bf16.mxu1 %v1651_v47  ;;  %1474 = vmatpush3.bf16.msra.mxu0 %v1660_v45 }
  0x51   :  { %1411 = vmatmul.mubr.msk.bf16.gmra.mrb[28].mxu0 %vm178_vm0, %v1598_v39  ;;  %1419 = vmatmul.mubr.msk.bf16.gmra.mrb[28].mxu1 %vm178_vm0, %v1606_v42 }
  0x53   :  { %749 = vmatpush1.bf16.msra.mxu1 %v1649_v48  ;;  %v1661_v48 = vld [vmem:[%s2537_s5 + $0x58] sm:$0xff]  }
  0x54   :  { %750 = vmatprep.subr.bf16.mxu1 %v1654_v50  ;;  %1475 = vmatprep.subr.bf16.mxu0 %v1661_v48 }
  0x57   :  { %751 = vmatpush1.bf16.msra.mxu1 %v1652_v49 }
  0xec   :  { %v261_v58 = vpop.f32.mrb[0].mxu0  ;;  %v341_v2 = vpop.f32.mrb[0].mxu1 }
  0xed   :  { %v262_v59 = vadd.f32 %v261_v58, %v2194_v56  ;;  %v263_v60 = vpop.f32.mrb[1].mxu0  ;;  %v342_v3 = vadd.f32 %v341_v2, %v2194_v56  ;;  %v343_v4 = vpop.f32.mrb[1].mxu1  ;;  %v1663_v2 = vld [vmem:[%s2537_s5 + $0x60] sm:$0xff]  }
  0xee   :  { %v264_v61 = vadd.f32 %v263_v60, %v2198_v57  ;;  %v265_v62 = vpop.f32.mrb[2].mxu0  ;;  %v344_v6 = vadd.f32 %v343_v4, %v2198_v57  ;;  %v345_v7 = vpop.f32.mrb[2].mxu1  ;;  %v1662_v60 = vld [vmem:[%s2537_s5 + $0x18] sm:$0xff]  }
  0xef   :  { %1671 = vtanh.f32 %v262_v59  ;;  %v266_v63 = vadd.f32 %v265_v62, %v2194_v56  ;;  %v267_v0 = vpop.f32.mrb[3].mxu0  ;;  %v346_v10 = vadd.f32 %v345_v7, %v2194_v56  ;;  %v347_v11 = vpop.f32.mrb[3].mxu1  ;;  %1476 = vmatpush3.bf16.msra.mxu0 %v1662_v60 }
  0xf0   :  { %1673 = vtanh.f32 %v264_v61  ;;  %v268_v1 = vadd.f32 %v267_v0, %v2198_v57  ;;  %v348_v17 = vadd.f32 %v347_v11, %v2198_v57  ;;  %1477 = vmatprep.subr.bf16.mxu0 %v1663_v2 }
  0xf1   :  { %1675 = vtanh.f32 %v266_v63 }
  0xf2   :  { %1677 = vtanh.f32 %v268_v1 }
  0xf3   :  { %1679 = vtanh.f32 %v342_v3  ;;  %1478 = vmatpush3.bf16.msra.mxu0 %v1664_v18 }
  0xf4   :  { %v271_v5 = vpop.f32.mrb[4].mxu0  ;;  %1681 = vtanh.f32 %v344_v6  ;;  %v351_v23 = vpop.f32.mrb[4].mxu1 }
  0xf5   :  { %v272_v8 = vadd.f32 %v271_v5, %v2194_v56  ;;  %v273_v9 = vpop.f32.mrb[5].mxu0  ;;  %v352_v25 = vadd.f32 %v351_v23, %v2194_v56  ;;  %v353_v26 = vpop.f32.mrb[5].mxu1 }
  0xf6   :  { %v274_v12 = vadd.f32 %v273_v9, %v2198_v57  ;;  %v275_v13 = vpop.f32.mrb[6].mxu0  ;;  %v354_v31 = vadd.f32 %v353_v26, %v2198_v57  ;;  %v355_v32 = vpop.f32.mrb[6].mxu1 }
  0xf7   :  { %1683 = vtanh.f32 %v272_v8  ;;  %v276_v14 = vadd.f32 %v275_v13, %v2194_v56  ;;  %v277_v15 = vpop.f32.mrb[7].mxu0  ;;  %v356_v37 = vadd.f32 %v355_v32, %v2194_v56  ;;  %v357_v38 = vpop.f32.mrb[7].mxu1 }
  0xf8   :  { %1685 = vtanh.f32 %v274_v12  ;;  %v278_v16 = vadd.f32 %v277_v15, %v2198_v57  ;;  %v358_v41 = vadd.f32 %v357_v38, %v2198_v57 }
  0xf9   :  { %v1672_v21 = vpop.eup %1671  ;;  %1687 = vtanh.f32 %v276_v14 }
  0xfa   :  { %v1674_v22 = vpop.eup %1673  ;;  %1689 = vtanh.f32 %v278_v16 }
  0xfb   :  { %v1676_v24 = vpop.eup %1675  ;;  %1691 = vtanh.f32 %v346_v10 }
  0xfc   :  { %v1678_v28 = vpop.eup %1677  ;;  %v281_v29 = vpop.f32.mrb[8].mxu0  ;;  %v484_v30 = vpack.c.bf16 %v1676_v24, %v1672_v21  ;;  %1693 = vtanh.f32 %v348_v17  ;;  %v1665_v21 = vld [vmem:[%s2537_s5 + $0x68] sm:$0xff]  }
  0xfd   :  { %v282_v34 = vadd.f32 %v281_v29, %v2194_v56  ;;  %v283_v35 = vpop.f32.mrb[9].mxu0  ;;  %v485_v36 = vpack.c.bf16 %v1678_v28, %v1674_v22  ;;  %1695 = vtanh.f32 %v352_v25  ;;  %v2233_v42 = vpop.eup %1679  ;;  %v1666_v28 = vld [vmem:[%s2537_s5 + $0x28] sm:$0xff]   ;;  %1479 = vmatprep.subr.bf16.mxu0 %v1665_v21 }
  0xfe   :  { %v284_v39 = vadd.f32 %v283_v35, %v2198_v57  ;;  %v285_v40 = vpop.f32.mrb[10].mxu0  ;;  %1697 = vtanh.f32 %v354_v31  ;;  %v2239_v46 = vpop.eup %1681  ;;  %1480 = vmatpush3.bf16.msra.mxu0 %v1666_v28 }
  0xff   :  { %1699 = vtanh.f32 %v282_v34  ;;  %v286_v43 = vadd.f32 %v285_v40, %v2194_v56  ;;  %v287_v44 = vpop.f32.mrb[11].mxu0  ;;  %752 = vmatprep.mubr.bf16.mxu1 %v485_v36  ;;  %v361_v51 = vpop.f32.mrb[8].mxu1 }
 0x100   :  { %1701 = vtanh.f32 %v284_v39  ;;  %v288_v47 = vadd.f32 %v287_v44, %v2198_v57  ;;  %753 = vmatmul.mubr.bf16.vlgmr.msra.gmra.mrb[32].mxu1 %v484_v30  ;;  %v362_v58 = vadd.f32 %v361_v51, %v2194_v56  ;;  %v363_v59 = vpop.f32.mrb[9].mxu1 }
 0x101   :  { %v1684_v49 = vpop.eup %1683  ;;  %1703 = vtanh.f32 %v286_v43  ;;  %v364_v0 = vadd.f32 %v363_v59, %v2198_v57  ;;  %v365_v1 = vpop.f32.mrb[10].mxu1 }
 0x102   :  { %v1686_v50 = vpop.eup %1685  ;;  %1705 = vtanh.f32 %v288_v47  ;;  %v366_v7 = vadd.f32 %v365_v1, %v2194_v56  ;;  %v367_v8 = vpop.f32.mrb[11].mxu1 }
 0x103   :  { %v1688_v54 = vpop.eup %1687  ;;  %1707 = vtanh.f32 %v356_v37  ;;  %v368_v12 = vadd.f32 %v367_v8, %v2198_v57 }
 0x104   :  { %v1690_v61 = vpop.eup %1689  ;;  %v291_v62 = vpop.f32.mrb[12].mxu0  ;;  %v486_v63 = vpack.c.bf16 %v1688_v54, %v1684_v49  ;;  %1709 = vtanh.f32 %v358_v41 }
 0x105   :  { %v2253_v3 = vpop.eup %1691  ;;  %v292_v4 = vadd.f32 %v291_v62, %v2194_v56  ;;  %v293_v5 = vpop.f32.mrb[13].mxu0  ;;  %v487_v6 = vpack.c.bf16 %v1690_v61, %v1686_v50  ;;  %1711 = vtanh.f32 %v362_v58 }
 0x106   :  { %v2257_v9 = vpop.eup %1693  ;;  %v294_v10 = vadd.f32 %v293_v5, %v2198_v57  ;;  %v295_v11 = vpop.f32.mrb[14].mxu0  ;;  %1713 = vtanh.f32 %v364_v0  ;;  %v500_v13 = vpack.c.bf16 %v2253_v3, %v2233_v42  ;;  %v1667_v42 = vld [vmem:[%s2537_s5 + $0x70] sm:$0xff]   ;;  %v1669_v3 = vld [vmem:[%s2537_s5 + $0x78] sm:$0xff]  }
 0x107   :  { %v2263_v14 = vpop.eup %1695  ;;  %1715 = vtanh.f32 %v292_v4  ;;  %v296_v15 = vadd.f32 %v295_v11, %v2194_v56  ;;  %v297_v16 = vpop.f32.mrb[15].mxu0  ;;  %762 = vmatprep.mubr.bf16.mxu1 %v487_v6  ;;  %v501_v17 = vpack.c.bf16 %v2257_v9, %v2239_v46  ;;  %v1668_v46 = vld [vmem:[%s2537_s5 + $0x30] sm:$0xff]   ;;  %1481 = vmatprep.subr.bf16.mxu0 %v1667_v42  ;;  %v1670_v9 = vld [vmem:[%s2537_s5 + $0x38] sm:$0xff]  }
 0x108   :  { %v2271_v19 = vpop.eup %1697  ;;  %1717 = vtanh.f32 %v294_v10  ;;  %v298_v20 = vadd.f32 %v297_v16, %v2198_v57  ;;  %763 = vmatmul.mubr.bf16.gmra.mrb[36].mxu1 %v486_v63  ;;  %v371_v24 = vpop.f32.mrb[12].mxu1  ;;  %1482 = vmatpush3.bf16.msra.mxu0 %v1668_v46 }
 0x109   :  { %v1700_v22 = vpop.eup %1699  ;;  %1719 = vtanh.f32 %v296_v15  ;;  %v372_v26 = vadd.f32 %v371_v24, %v2194_v56  ;;  %v373_v27 = vpop.f32.mrb[13].mxu1  ;;  %1483 = vmatprep.subr.bf16.mxu0 %v1669_v3 }
 0x10a   :  { %v1702_v23 = vpop.eup %1701  ;;  %1721 = vtanh.f32 %v298_v20  ;;  %v374_v32 = vadd.f32 %v373_v27, %v2198_v57  ;;  %v375_v33 = vpop.f32.mrb[14].mxu1 }
 0x10b   :  { %v1704_v25 = vpop.eup %1703  ;;  %1723 = vtanh.f32 %v366_v7  ;;  %v376_v38 = vadd.f32 %v375_v33, %v2194_v56  ;;  %v377_v39 = vpop.f32.mrb[15].mxu1 }
 0x10c   :  { %v1706_v29 = vpop.eup %1705  ;;  %v301_v30 = vpop.f32.mrb[16].mxu0  ;;  %v488_v31 = vpack.c.bf16 %v1704_v25, %v1700_v22  ;;  %1725 = vtanh.f32 %v368_v12  ;;  %v378_v44 = vadd.f32 %v377_v39, %v2198_v57  ;;  %1484 = vmatpush3.bf16.msra.mxu0 %v1670_v9 }
 0x10d   :  { %v2282_v34 = vpop.eup %1707  ;;  %v302_v35 = vadd.f32 %v301_v30, %v2194_v56  ;;  %v303_v36 = vpop.f32.mrb[17].mxu0  ;;  %v489_v37 = vpack.c.bf16 %v1706_v29, %v1702_v23  ;;  %1727 = vtanh.f32 %v372_v26 }
 0x10e   :  { %v2286_v40 = vpop.eup %1709  ;;  %v304_v41 = vadd.f32 %v303_v36, %v2198_v57  ;;  %v305_v43 = vpop.f32.mrb[18].mxu0  ;;  %1729 = vtanh.f32 %v374_v32  ;;  %v502_v45 = vpack.c.bf16 %v2282_v34, %v2263_v14 }
 0x10f   :  { %v2292_v47 = vpop.eup %1711  ;;  %1731 = vtanh.f32 %v302_v35  ;;  %v306_v48 = vadd.f32 %v305_v43, %v2194_v56  ;;  %v307_v49 = vpop.f32.mrb[19].mxu0  ;;  %772 = vmatprep.mubr.bf16.mxu1 %v489_v37  ;;  %v503_v50 = vpack.c.bf16 %v2286_v40, %v2271_v19 }
 0x110   :  { %v2297_v51 = vpop.eup %1713  ;;  %1733 = vtanh.f32 %v304_v41  ;;  %v308_v54 = vadd.f32 %v307_v49, %v2198_v57  ;;  %773 = vmatmul.mubr.bf16.gmra.mrb[40].mxu1 %v488_v31  ;;  %v381_v60 = vpop.f32.mrb[16].mxu1 }
 0x111   :  { %v1716_v58 = vpop.eup %1715  ;;  %1735 = vtanh.f32 %v306_v48  ;;  %v382_v62 = vadd.f32 %v381_v60, %v2194_v56  ;;  %v383_v63 = vpop.f32.mrb[17].mxu1 }
 0x112   :  { %v1718_v59 = vpop.eup %1717  ;;  %1737 = vtanh.f32 %v308_v54  ;;  %v384_v4 = vadd.f32 %v383_v63, %v2198_v57  ;;  %v385_v5 = vpop.f32.mrb[18].mxu1 }
 0x113   :  { %v1720_v61 = vpop.eup %1719  ;;  %1739 = vtanh.f32 %v376_v38  ;;  %v386_v11 = vadd.f32 %v385_v5, %v2194_v56  ;;  %v387_v12 = vpop.f32.mrb[19].mxu1 }
 0x114   :  { %v1722_v0 = vpop.eup %1721  ;;  %v311_v1 = vpop.f32.mrb[20].mxu0  ;;  %v490_v2 = vpack.c.bf16 %v1720_v61, %v1716_v58  ;;  %1741 = vtanh.f32 %v378_v44  ;;  %v388_v20 = vadd.f32 %v387_v12, %v2198_v57 }
 0x115   :  { %v2302_v6 = vpop.eup %1723  ;;  %v312_v7 = vadd.f32 %v311_v1, %v2194_v56  ;;  %v313_v8 = vpop.f32.mrb[21].mxu0  ;;  %v491_v10 = vpack.c.bf16 %v1722_v0, %v1718_v59  ;;  %1743 = vtanh.f32 %v382_v62 }
 0x116   :  { %v2306_v15 = vpop.eup %1725  ;;  %v314_v16 = vadd.f32 %v313_v8, %v2198_v57  ;;  %v315_v18 = vpop.f32.mrb[22].mxu0  ;;  %1745 = vtanh.f32 %v384_v4  ;;  %v504_v21 = vpack.c.bf16 %v2302_v6, %v2292_v47 }
 0x117   :  { %v2312_v22 = vpop.eup %1727  ;;  %1747 = vtanh.f32 %v312_v7  ;;  %v316_v23 = vadd.f32 %v315_v18, %v2194_v56  ;;  %v317_v24 = vpop.f32.mrb[23].mxu0  ;;  %782 = vmatprep.mubr.bf16.mxu1 %v491_v10  ;;  %v505_v25 = vpack.c.bf16 %v2306_v15, %v2297_v51 }
 0x118   :  { %v2317_v26 = vpop.eup %1729  ;;  %1749 = vtanh.f32 %v314_v16  ;;  %v318_v27 = vadd.f32 %v317_v24, %v2198_v57  ;;  %783 = vmatmul.mubr.bf16.gmra.mrb[44].mxu1 %v490_v2  ;;  %v391_v30 = vpop.f32.mrb[20].mxu1 }
 0x119   :  { %v1732_v28 = vpop.eup %1731  ;;  %1751 = vtanh.f32 %v316_v23  ;;  %v392_v32 = vadd.f32 %v391_v30, %v2194_v56  ;;  %v393_v33 = vpop.f32.mrb[21].mxu1 }
 0x11a   :  { %v1734_v29 = vpop.eup %1733  ;;  %1753 = vtanh.f32 %v318_v27  ;;  %v394_v38 = vadd.f32 %v393_v33, %v2198_v57  ;;  %v395_v39 = vpop.f32.mrb[22].mxu1 }
 0x11b   :  { %v1736_v31 = vpop.eup %1735  ;;  %1755 = vtanh.f32 %v386_v11  ;;  %v396_v49 = vadd.f32 %v395_v39, %v2194_v56  ;;  %v397_v54 = vpop.f32.mrb[23].mxu1 }
 0x11c   :  { %v1738_v35 = vpop.eup %1737  ;;  %v321_v36 = vpop.f32.mrb[24].mxu0  ;;  %v492_v37 = vpack.c.bf16 %v1736_v31, %v1732_v28  ;;  %1757 = vtanh.f32 %v388_v20  ;;  %v398_v61 = vadd.f32 %v397_v54, %v2198_v57 }
 0x11d   :  { %v2322_v41 = vpop.eup %1739  ;;  %v322_v43 = vadd.f32 %v321_v36, %v2194_v56  ;;  %v323_v44 = vpop.f32.mrb[25].mxu0  ;;  %v493_v48 = vpack.c.bf16 %v1738_v35, %v1734_v29  ;;  %1759 = vtanh.f32 %v392_v32 }
 0x11e   :  { %v2326_v58 = vpop.eup %1741  ;;  %v324_v59 = vadd.f32 %v323_v44, %v2198_v57  ;;  %v325_v60 = vpop.f32.mrb[26].mxu0  ;;  %1761 = vtanh.f32 %v394_v38  ;;  %v506_v62 = vpack.c.bf16 %v2322_v41, %v2312_v22 }
 0x11f   :  { %v2332_v63 = vpop.eup %1743  ;;  %1763 = vtanh.f32 %v322_v43  ;;  %v326_v0 = vadd.f32 %v325_v60, %v2194_v56  ;;  %v327_v1 = vpop.f32.mrb[27].mxu0  ;;  %792 = vmatprep.mubr.bf16.mxu1 %v493_v48  ;;  %v507_v2 = vpack.c.bf16 %v2326_v58, %v2317_v26 }
 0x120   :  { %v2337_v4 = vpop.eup %1745  ;;  %1765 = vtanh.f32 %v324_v59  ;;  %v328_v5 = vadd.f32 %v327_v1, %v2198_v57  ;;  %793 = vmatmul.mubr.bf16.gmra.mrb[48].mxu1 %v492_v37  ;;  %v401_v10 = vpop.f32.mrb[24].mxu1 }
 0x121   :  { %v1748_v7 = vpop.eup %1747  ;;  %1767 = vtanh.f32 %v326_v0  ;;  %v402_v12 = vadd.f32 %v401_v10, %v2194_v56  ;;  %v403_v16 = vpop.f32.mrb[25].mxu1 }
 0x122   :  { %v1750_v8 = vpop.eup %1749  ;;  %1769 = vtanh.f32 %v328_v5  ;;  %v404_v24 = vadd.f32 %v403_v16, %v2198_v57  ;;  %v405_v27 = vpop.f32.mrb[26].mxu1 }
 0x123   :  { %v1752_v11 = vpop.eup %1751  ;;  %1771 = vtanh.f32 %v396_v49  ;;  %v406_v32 = vadd.f32 %v405_v27, %v2194_v56  ;;  %v407_v33 = vpop.f32.mrb[27].mxu1 }
 0x124   :  { %v1754_v18 = vpop.eup %1753  ;;  %v331_v20 = vpop.f32.mrb[28].mxu0  ;;  %v494_v23 = vpack.c.bf16 %v1752_v11, %v1748_v7  ;;  %1773 = vtanh.f32 %v398_v61  ;;  %v408_v38 = vadd.f32 %v407_v33, %v2198_v57 }
 0x125   :  { %v2342_v28 = vpop.eup %1755  ;;  %v332_v29 = vadd.f32 %v331_v20, %v2194_v56  ;;  %v333_v30 = vpop.f32.mrb[29].mxu0  ;;  %v495_v31 = vpack.c.bf16 %v1754_v18, %v1750_v8  ;;  %1775 = vtanh.f32 %v402_v12 }
 0x126   :  { %v2346_v35 = vpop.eup %1757  ;;  %v334_v36 = vadd.f32 %v333_v30, %v2198_v57  ;;  %v335_v37 = vpop.f32.mrb[30].mxu0  ;;  %1777 = vtanh.f32 %v404_v24  ;;  %v508_v39 = vpack.c.bf16 %v2342_v28, %v2332_v63 }
 0x127   :  { %v2352_v43 = vpop.eup %1759  ;;  %1779 = vtanh.f32 %v332_v29  ;;  %v336_v44 = vadd.f32 %v335_v37, %v2194_v56  ;;  %v337_v48 = vpop.f32.mrb[31].mxu0  ;;  %802 = vmatprep.mubr.bf16.mxu1 %v495_v31  ;;  %v509_v49 = vpack.c.bf16 %v2346_v35, %v2337_v4 }
 0x128   :  { %v2357_v54 = vpop.eup %1761  ;;  %1781 = vtanh.f32 %v334_v36  ;;  %v338_v59 = vadd.f32 %v337_v48, %v2198_v57  ;;  %803 = vmatmul.mubr.bf16.gmra.mrb[52].mxu1 %v494_v23  ;;  %v411_v0 = vpop.f32.mrb[28].mxu1 }
 0x129   :  { %v1764_v60 = vpop.eup %1763  ;;  %1783 = vtanh.f32 %v336_v44  ;;  %v412_v5 = vadd.f32 %v411_v0, %v2194_v56  ;;  %v413_v7 = vpop.f32.mrb[29].mxu1 }
 0x12a   :  { %v1766_v61 = vpop.eup %1765  ;;  %1785 = vtanh.f32 %v338_v59  ;;  %v414_v4 = vadd.f32 %v413_v7, %v2198_v57  ;;  %v415_v11 = vpop.f32.mrb[30].mxu1 }
 0x12b   :  { %v1768_v1 = vpop.eup %1767  ;;  %1787 = vtanh.f32 %v406_v32  ;;  %v416_v18 = vadd.f32 %v415_v11, %v2194_v56  ;;  %v417_v20 = vpop.f32.mrb[31].mxu1 }
 0x12c   :  { %v1770_v8 = vpop.eup %1769  ;;  %v496_v10 = vpack.c.bf16 %v1768_v1, %v1764_v60  ;;  %1789 = vtanh.f32 %v408_v38  ;;  %v418_v24 = vadd.f32 %v417_v20, %v2198_v57 }
 0x12d   :  { %v1772_v12 = vpop.eup %1771  ;;  %v497_v16 = vpack.c.bf16 %v1770_v8, %v1766_v61  ;;  %1791 = vtanh.f32 %v412_v5 }
 0x12e   :  { %v1774_v23 = vpop.eup %1773  ;;  %1793 = vtanh.f32 %v414_v4  ;;  %v510_v27 = vpack.c.bf16 %v1772_v12, %v2352_v43 }
 0x12f   :  { %v1776_v29 = vpop.eup %1775  ;;  %812 = vmatprep.mubr.bf16.mxu1 %v497_v16  ;;  %1795 = vtanh.f32 %v416_v18  ;;  %v511_v30 = vpack.c.bf16 %v1774_v23, %v2357_v54 }
 0x130   :  { %v1778_v31 = vpop.eup %1777  ;;  %813 = vmatmul.mubr.bf16.gmra.mrb[56].mxu1 %v496_v10  ;;  %1797 = vtanh.f32 %v418_v24 }
 0x131   :  { %v1780_v32 = vpop.eup %1779 }
 0x132   :  { %v1782_v33 = vpop.eup %1781 }
 0x133   :  { %v1784_v35 = vpop.eup %1783 }
 0x134   :  { %v1786_v36 = vpop.eup %1785  ;;  %v498_v56 = vpack.c.bf16 %v1784_v35, %v1780_v32 }
 0x135   :  { %v1788_v37 = vpop.eup %1787  ;;  %v499_v38 = vpack.c.bf16 %v1786_v36, %v1782_v33 }
 0x136   :  { %v1790_v44 = vpop.eup %1789  ;;  %v512_v48 = vpack.c.bf16 %v1788_v37, %v1776_v29 }
 0x137   :  { %v1792_v57 = vpop.eup %1791  ;;  %822 = vmatprep.mubr.bf16.mxu1 %v499_v38  ;;  %v513_v43 = vpack.c.bf16 %v1790_v44, %v1778_v31 }
 0x138   :  { %v1794_v59 = vpop.eup %1793  ;;  %823 = vmatmul.mubr.bf16.gmra.mrb[60].mxu1 %v498_v56 }
 0x139   :  { %v1796_v60 = vpop.eup %1795  ;;  %832 = vmatprep.mubr.bf16.mxu1 %v501_v17 }
 0x13a   :  { %v1798_v54 = vpop.eup %1797  ;;  %v514_v61 = vpack.c.bf16 %v1796_v60, %v1792_v57 }
 0x13b   :  { %v515_v0 = vpack.c.bf16 %v1798_v54, %v1794_v59 }
 0x140   :  { %833 = vmatmul.mubr.bf16.gmra.mrb[64].mxu1 %v500_v13  ;;  %v548_v13 = vld [vmem:[%s2536_s4] sm:$0x3] }
 0x141   :  { %842 = vmatprep.mubr.bf16.mxu1 %v503_v50  ;;  %v2410_v14 = vrot.slane %v548_v13, %v80_v53  ;;  %v2414_v17 = vrot.slane %v548_v13, %v84_v55 }
 0x148   :  { %843 = vmatmul.mubr.bf16.gmra.mrb[68].mxu1 %v502_v45 }
 0x149   :  { %852 = vmatprep.mubr.bf16.mxu1 %v505_v25 }
 0x150   :  { %853 = vmatmul.mubr.bf16.gmra.mrb[72].mxu1 %v504_v21 }
 0x151   :  { %862 = vmatprep.mubr.bf16.mxu1 %v507_v2 }
 0x158   :  { %863 = vmatmul.mubr.bf16.gmra.mrb[76].mxu1 %v506_v62 }
 0x159   :  { %872 = vmatprep.mubr.bf16.mxu1 %v509_v49 }
 0x160   :  { %873 = vmatmul.mubr.bf16.gmra.mrb[80].mxu1 %v508_v39 }
 0x161   :  { %882 = vmatprep.mubr.bf16.mxu1 %v511_v30 }
 0x168   :  { %883 = vmatmul.mubr.bf16.gmra.mrb[84].mxu1 %v510_v27 }
 0x169   :  { %892 = vmatprep.mubr.bf16.mxu1 %v513_v43 }
 0x170   :  { %893 = vmatmul.mubr.bf16.gmra.mrb[88].mxu1 %v512_v48 }
 0x171   :  { %902 = vmatprep.mubr.bf16.mxu1 %v515_v0 }
 0x178   :  { %903 = vmatmul.mubr.bf16.gmra.mrb[92].mxu1 %v514_v61 }
 0x1d3   :  { %v754_v19 = vpop.f32.mrb[32].mxu1 }
 0x1d4   :  { %v755_v34 = vadd.f32 %v754_v19, %v2410_v14  ;;  %v756_v40 = vpop.f32.mrb[33].mxu1 }
 0x1d5   :  { %v757_v45 = vadd.f32 %v756_v40, %v2414_v17  ;;  %v758_v47 = vpop.f32.mrb[34].mxu1 }
 0x1d6   :  { %1799 = vtanh.f32 %v755_v34  ;;  %v759_v50 = vadd.f32 %v758_v47, %v2410_v14  ;;  %v760_v51 = vpop.f32.mrb[35].mxu1 }
 0x1d7   :  { %1801 = vtanh.f32 %v757_v45  ;;  %v761_v6 = vadd.f32 %v760_v51, %v2414_v17 }
 0x1d8   :  { %1803 = vtanh.f32 %v759_v50 }
 0x1d9   :  { %1805 = vtanh.f32 %v761_v6 }
 0x1db   :  { %v764_v53 = vpop.f32.mrb[36].mxu1 }
 0x1dc   :  { %v765_v52 = vadd.f32 %v764_v53, %v2410_v14  ;;  %v766_v55 = vpop.f32.mrb[37].mxu1 }
 0x1dd   :  { %v767_v15 = vadd.f32 %v766_v55, %v2414_v17  ;;  %v768_v21 = vpop.f32.mrb[38].mxu1 }
 0x1de   :  { %1807 = vtanh.f32 %v765_v52  ;;  %v769_v22 = vadd.f32 %v768_v21, %v2410_v14  ;;  %v770_v25 = vpop.f32.mrb[39].mxu1 }
 0x1df   :  { %1809 = vtanh.f32 %v767_v15  ;;  %v771_v26 = vadd.f32 %v770_v25, %v2414_v17 }
 0x1e0   :  { %v1800_v41 = vpop.eup %1799  ;;  %1811 = vtanh.f32 %v769_v22 }
 0x1e1   :  { %v1802_v58 = vpop.eup %1801  ;;  %1813 = vtanh.f32 %v771_v26 }
 0x1e2   :  { %v1804_v62 = vpop.eup %1803 }
 0x1e3   :  { %v1806_v63 = vpop.eup %1805  ;;  %v774_v2 = vpop.f32.mrb[40].mxu1  ;;  %v977_v28 = vpack.c.bf16 %v1804_v62, %v1800_v41 }
 0x1e4   :  { %v775_v39 = vadd.f32 %v774_v2, %v2410_v14  ;;  %v776_v49 = vpop.f32.mrb[41].mxu1  ;;  %v978_v1 = vpack.c.bf16 %v1806_v63, %v1802_v58 }
 0x1e5   :  { %v777_v5 = vadd.f32 %v776_v49, %v2414_v17  ;;  %v778_v7 = vpop.f32.mrb[42].mxu1 }
 0x1e6   :  { %1815 = vtanh.f32 %v775_v39  ;;  %v779_v8 = vadd.f32 %v778_v7, %v2410_v14  ;;  %v780_v10 = vpop.f32.mrb[43].mxu1  ;;  %1176 = vmatprep.mubr.bf16.mxu0 %v978_v1 }
 0x1e7   :  { %1817 = vtanh.f32 %v777_v5  ;;  %v781_v4 = vadd.f32 %v780_v10, %v2414_v17  ;;  %1177 = vmatmul.mubr.bf16.vlgmr.msra.gmra.mrb[32].mxu0 %v977_v28 }
 0x1e8   :  { %v1808_v11 = vpop.eup %1807  ;;  %1819 = vtanh.f32 %v779_v8 }
 0x1e9   :  { %v1810_v12 = vpop.eup %1809  ;;  %1821 = vtanh.f32 %v781_v4 }
 0x1ea   :  { %v1812_v16 = vpop.eup %1811 }
 0x1eb   :  { %v1814_v18 = vpop.eup %1813  ;;  %v784_v20 = vpop.f32.mrb[44].mxu1  ;;  %v979_v23 = vpack.c.bf16 %v1812_v16, %v1808_v11 }
 0x1ec   :  { %v785_v24 = vadd.f32 %v784_v20, %v2410_v14  ;;  %v786_v27 = vpop.f32.mrb[45].mxu1  ;;  %v980_v29 = vpack.c.bf16 %v1814_v18, %v1810_v12 }
 0x1ed   :  { %v787_v30 = vadd.f32 %v786_v27, %v2414_v17  ;;  %v788_v31 = vpop.f32.mrb[46].mxu1 }
 0x1ee   :  { %1823 = vtanh.f32 %v785_v24  ;;  %v789_v32 = vadd.f32 %v788_v31, %v2410_v14  ;;  %v790_v33 = vpop.f32.mrb[47].mxu1  ;;  %1184 = vmatprep.mubr.bf16.mxu0 %v980_v29 }
 0x1ef   :  { %1825 = vtanh.f32 %v787_v30  ;;  %v791_v35 = vadd.f32 %v790_v33, %v2414_v17  ;;  %1185 = vmatmul.mubr.bf16.gmra.mrb[36].mxu0 %v979_v23 }
 0x1f0   :  { %v1816_v36 = vpop.eup %1815  ;;  %1827 = vtanh.f32 %v789_v32 }
 0x1f1   :  { %v1818_v56 = vpop.eup %1817  ;;  %1829 = vtanh.f32 %v791_v35 }
 0x1f2   :  { %v1820_v37 = vpop.eup %1819 }
 0x1f3   :  { %v1822_v38 = vpop.eup %1821  ;;  %v794_v44 = vpop.f32.mrb[48].mxu1  ;;  %v981_v48 = vpack.c.bf16 %v1820_v37, %v1816_v36 }
 0x1f4   :  { %v795_v57 = vadd.f32 %v794_v44, %v2410_v14  ;;  %v796_v43 = vpop.f32.mrb[49].mxu1  ;;  %v982_v59 = vpack.c.bf16 %v1822_v38, %v1818_v56 }
 0x1f5   :  { %v797_v60 = vadd.f32 %v796_v43, %v2414_v17  ;;  %v798_v54 = vpop.f32.mrb[50].mxu1 }
 0x1f6   :  { %1831 = vtanh.f32 %v795_v57  ;;  %v799_v61 = vadd.f32 %v798_v54, %v2410_v14  ;;  %v800_v0 = vpop.f32.mrb[51].mxu1  ;;  %1192 = vmatprep.mubr.bf16.mxu0 %v982_v59 }
 0x1f7   :  { %1833 = vtanh.f32 %v797_v60  ;;  %v801_v42 = vadd.f32 %v800_v0, %v2414_v17  ;;  %1193 = vmatmul.mubr.bf16.gmra.mrb[40].mxu0 %v981_v48 }
 0x1f8   :  { %v1824_v46 = vpop.eup %1823  ;;  %1835 = vtanh.f32 %v799_v61 }
 0x1f9   :  { %v1826_v3 = vpop.eup %1825  ;;  %1837 = vtanh.f32 %v801_v42 }
 0x1fa   :  { %v1828_v9 = vpop.eup %1827 }
 0x1fb   :  { %v1830_v13 = vpop.eup %1829  ;;  %v804_v19 = vpop.f32.mrb[52].mxu1  ;;  %v983_v34 = vpack.c.bf16 %v1828_v9, %v1824_v46 }
 0x1fc   :  { %v805_v40 = vadd.f32 %v804_v19, %v2410_v14  ;;  %v806_v45 = vpop.f32.mrb[53].mxu1  ;;  %v984_v47 = vpack.c.bf16 %v1830_v13, %v1826_v3 }
 0x1fd   :  { %v807_v50 = vadd.f32 %v806_v45, %v2414_v17  ;;  %v808_v51 = vpop.f32.mrb[54].mxu1 }
 0x1fe   :  { %1839 = vtanh.f32 %v805_v40  ;;  %v809_v6 = vadd.f32 %v808_v51, %v2410_v14  ;;  %v810_v53 = vpop.f32.mrb[55].mxu1  ;;  %1200 = vmatprep.mubr.bf16.mxu0 %v984_v47 }
 0x1ff   :  { %1841 = vtanh.f32 %v807_v50  ;;  %v811_v52 = vadd.f32 %v810_v53, %v2414_v17  ;;  %1201 = vmatmul.mubr.bf16.gmra.mrb[44].mxu0 %v983_v34 }
 0x200   :  { %v1832_v55 = vpop.eup %1831  ;;  %1843 = vtanh.f32 %v809_v6 }
 0x201   :  { %v1834_v15 = vpop.eup %1833  ;;  %1845 = vtanh.f32 %v811_v52 }
 0x202   :  { %v1836_v21 = vpop.eup %1835 }
 0x203   :  { %v1838_v22 = vpop.eup %1837  ;;  %v814_v25 = vpop.f32.mrb[56].mxu1  ;;  %v985_v26 = vpack.c.bf16 %v1836_v21, %v1832_v55 }
 0x204   :  { %v815_v41 = vadd.f32 %v814_v25, %v2410_v14  ;;  %v816_v58 = vpop.f32.mrb[57].mxu1  ;;  %v986_v62 = vpack.c.bf16 %v1838_v22, %v1834_v15 }
 0x205   :  { %v817_v63 = vadd.f32 %v816_v58, %v2414_v17  ;;  %v818_v2 = vpop.f32.mrb[58].mxu1 }
 0x206   :  { %1847 = vtanh.f32 %v815_v41  ;;  %v819_v28 = vadd.f32 %v818_v2, %v2410_v14  ;;  %v820_v39 = vpop.f32.mrb[59].mxu1  ;;  %1208 = vmatprep.mubr.bf16.mxu0 %v986_v62 }
 0x207   :  { %1849 = vtanh.f32 %v817_v63  ;;  %v821_v49 = vadd.f32 %v820_v39, %v2414_v17  ;;  %1209 = vmatmul.mubr.bf16.gmra.mrb[48].mxu0 %v985_v26 }
 0x208   :  { %v1840_v1 = vpop.eup %1839  ;;  %1851 = vtanh.f32 %v819_v28 }
 0x209   :  { %v1842_v5 = vpop.eup %1841  ;;  %1853 = vtanh.f32 %v821_v49 }
 0x20a   :  { %v1844_v7 = vpop.eup %1843 }
 0x20b   :  { %v1846_v8 = vpop.eup %1845  ;;  %v824_v10 = vpop.f32.mrb[60].mxu1  ;;  %v987_v4 = vpack.c.bf16 %v1844_v7, %v1840_v1 }
 0x20c   :  { %v825_v11 = vadd.f32 %v824_v10, %v2410_v14  ;;  %v826_v12 = vpop.f32.mrb[61].mxu1  ;;  %v988_v16 = vpack.c.bf16 %v1846_v8, %v1842_v5 }
 0x20d   :  { %v827_v18 = vadd.f32 %v826_v12, %v2414_v17  ;;  %v828_v20 = vpop.f32.mrb[62].mxu1 }
 0x20e   :  { %1855 = vtanh.f32 %v825_v11  ;;  %v829_v23 = vadd.f32 %v828_v20, %v2410_v14  ;;  %v830_v24 = vpop.f32.mrb[63].mxu1  ;;  %1216 = vmatprep.mubr.bf16.mxu0 %v988_v16 }
 0x20f   :  { %1857 = vtanh.f32 %v827_v18  ;;  %v831_v27 = vadd.f32 %v830_v24, %v2414_v17  ;;  %1217 = vmatmul.mubr.bf16.gmra.mrb[52].mxu0 %v987_v4 }
 0x210   :  { %v1848_v29 = vpop.eup %1847  ;;  %1859 = vtanh.f32 %v829_v23 }
 0x211   :  { %v1850_v30 = vpop.eup %1849  ;;  %1861 = vtanh.f32 %v831_v27 }
 0x212   :  { %v1852_v31 = vpop.eup %1851 }
 0x213   :  { %v1854_v32 = vpop.eup %1853  ;;  %v834_v33 = vpop.f32.mrb[64].mxu1  ;;  %v989_v35 = vpack.c.bf16 %v1852_v31, %v1848_v29 }
 0x214   :  { %v835_v36 = vadd.f32 %v834_v33, %v2410_v14  ;;  %v836_v56 = vpop.f32.mrb[65].mxu1  ;;  %v990_v37 = vpack.c.bf16 %v1854_v32, %v1850_v30 }
 0x215   :  { %v837_v38 = vadd.f32 %v836_v56, %v2414_v17  ;;  %v838_v44 = vpop.f32.mrb[66].mxu1 }
 0x216   :  { %1863 = vtanh.f32 %v835_v36  ;;  %v839_v48 = vadd.f32 %v838_v44, %v2410_v14  ;;  %v840_v57 = vpop.f32.mrb[67].mxu1  ;;  %1224 = vmatprep.mubr.bf16.mxu0 %v990_v37 }
 0x217   :  { %1865 = vtanh.f32 %v837_v38  ;;  %v841_v43 = vadd.f32 %v840_v57, %v2414_v17  ;;  %1225 = vmatmul.mubr.bf16.gmra.mrb[56].mxu0 %v989_v35 }
 0x218   :  { %v1856_v59 = vpop.eup %1855  ;;  %1867 = vtanh.f32 %v839_v48 }
 0x219   :  { %v1858_v60 = vpop.eup %1857  ;;  %1869 = vtanh.f32 %v841_v43 }
 0x21a   :  { %v1860_v54 = vpop.eup %1859 }
 0x21b   :  { %v1862_v61 = vpop.eup %1861  ;;  %v844_v0 = vpop.f32.mrb[68].mxu1  ;;  %v991_v42 = vpack.c.bf16 %v1860_v54, %v1856_v59 }
 0x21c   :  { %v845_v46 = vadd.f32 %v844_v0, %v2410_v14  ;;  %v846_v3 = vpop.f32.mrb[69].mxu1  ;;  %v992_v9 = vpack.c.bf16 %v1862_v61, %v1858_v60 }
 0x21d   :  { %v847_v13 = vadd.f32 %v846_v3, %v2414_v17  ;;  %v848_v19 = vpop.f32.mrb[70].mxu1 }
 0x21e   :  { %1871 = vtanh.f32 %v845_v46  ;;  %v849_v34 = vadd.f32 %v848_v19, %v2410_v14  ;;  %v850_v40 = vpop.f32.mrb[71].mxu1  ;;  %1232 = vmatprep.mubr.bf16.mxu0 %v992_v9 }
 0x21f   :  { %1873 = vtanh.f32 %v847_v13  ;;  %v851_v45 = vadd.f32 %v850_v40, %v2414_v17  ;;  %1233 = vmatmul.mubr.bf16.gmra.mrb[60].mxu0 %v991_v42 }
 0x220   :  { %v1864_v47 = vpop.eup %1863  ;;  %1875 = vtanh.f32 %v849_v34 }
 0x221   :  { %v1866_v50 = vpop.eup %1865  ;;  %1877 = vtanh.f32 %v851_v45 }
 0x222   :  { %v1868_v51 = vpop.eup %1867 }
 0x223   :  { %v1870_v6 = vpop.eup %1869  ;;  %v854_v53 = vpop.f32.mrb[72].mxu1  ;;  %v993_v52 = vpack.c.bf16 %v1868_v51, %v1864_v47 }
 0x224   :  { %v855_v55 = vadd.f32 %v854_v53, %v2410_v14  ;;  %v856_v15 = vpop.f32.mrb[73].mxu1  ;;  %v994_v21 = vpack.c.bf16 %v1870_v6, %v1866_v50 }
 0x225   :  { %v857_v22 = vadd.f32 %v856_v15, %v2414_v17  ;;  %v858_v25 = vpop.f32.mrb[74].mxu1 }
 0x226   :  { %1879 = vtanh.f32 %v855_v55  ;;  %v859_v26 = vadd.f32 %v858_v25, %v2410_v14  ;;  %v860_v41 = vpop.f32.mrb[75].mxu1  ;;  %1240 = vmatprep.mubr.bf16.mxu0 %v994_v21 }
 0x227   :  { %1881 = vtanh.f32 %v857_v22  ;;  %v861_v58 = vadd.f32 %v860_v41, %v2414_v17  ;;  %1241 = vmatmul.mubr.bf16.gmra.mrb[64].mxu0 %v993_v52 }
 0x228   :  { %v1872_v62 = vpop.eup %1871  ;;  %1883 = vtanh.f32 %v859_v26 }
 0x229   :  { %v1874_v63 = vpop.eup %1873  ;;  %1885 = vtanh.f32 %v861_v58 }
 0x22a   :  { %v1876_v2 = vpop.eup %1875 }
 0x22b   :  { %v1878_v28 = vpop.eup %1877  ;;  %v864_v39 = vpop.f32.mrb[76].mxu1  ;;  %v995_v49 = vpack.c.bf16 %v1876_v2, %v1872_v62 }
 0x22c   :  { %v865_v1 = vadd.f32 %v864_v39, %v2410_v14  ;;  %v866_v5 = vpop.f32.mrb[77].mxu1  ;;  %v996_v7 = vpack.c.bf16 %v1878_v28, %v1874_v63 }
 0x22d   :  { %v867_v8 = vadd.f32 %v866_v5, %v2414_v17  ;;  %v868_v10 = vpop.f32.mrb[78].mxu1 }
 0x22e   :  { %1887 = vtanh.f32 %v865_v1  ;;  %v869_v4 = vadd.f32 %v868_v10, %v2410_v14  ;;  %v870_v11 = vpop.f32.mrb[79].mxu1  ;;  %1248 = vmatprep.mubr.bf16.mxu0 %v996_v7 }
 0x22f   :  { %1889 = vtanh.f32 %v867_v8  ;;  %v871_v12 = vadd.f32 %v870_v11, %v2414_v17  ;;  %1249 = vmatmul.mubr.bf16.gmra.mrb[68].mxu0 %v995_v49 }
 0x230   :  { %v1880_v16 = vpop.eup %1879  ;;  %1891 = vtanh.f32 %v869_v4 }
 0x231   :  { %v1882_v18 = vpop.eup %1881  ;;  %1893 = vtanh.f32 %v871_v12 }
 0x232   :  { %v1884_v20 = vpop.eup %1883 }
 0x233   :  { %v1886_v23 = vpop.eup %1885  ;;  %v874_v24 = vpop.f32.mrb[80].mxu1  ;;  %v997_v27 = vpack.c.bf16 %v1884_v20, %v1880_v16 }
 0x234   :  { %v875_v29 = vadd.f32 %v874_v24, %v2410_v14  ;;  %v876_v30 = vpop.f32.mrb[81].mxu1  ;;  %v998_v31 = vpack.c.bf16 %v1886_v23, %v1882_v18 }
 0x235   :  { %v877_v32 = vadd.f32 %v876_v30, %v2414_v17  ;;  %v878_v33 = vpop.f32.mrb[82].mxu1 }
 0x236   :  { %1895 = vtanh.f32 %v875_v29  ;;  %v879_v35 = vadd.f32 %v878_v33, %v2410_v14  ;;  %v880_v36 = vpop.f32.mrb[83].mxu1  ;;  %1256 = vmatprep.mubr.bf16.mxu0 %v998_v31 }
 0x237   :  { %1897 = vtanh.f32 %v877_v32  ;;  %v881_v56 = vadd.f32 %v880_v36, %v2414_v17  ;;  %1257 = vmatmul.mubr.bf16.gmra.mrb[72].mxu0 %v997_v27  ;;  %v2483_v27 = vld [vmem:[%s2538_s6] ss:$0 sm:$0xff]  ;;  %s2043_s6 = smov [#allocation5]  }
 0x238   :  { %v1888_v37 = vpop.eup %1887  ;;  %1899 = vtanh.f32 %v879_v35  ;;  %s1374_s14 = sshll.u32 %s2043_s6, 4  ;;  %s1375_s14 = int_to_ptr.vmem [resolvable:$true] %s1374_s14 }
 0x239   :  { %v1890_v38 = vpop.eup %1889  ;;  %1901 = vtanh.f32 %v881_v56  ;;  %s2013_s15 = scalar_lea.vmem %s1375_s14, 4096  ;;  %p2018_p9 = scmp.lt.s32.totalorder %s1375_s14, %s1375_s14 }
 0x23a   :  { %v1892_v44 = vpop.eup %1891  ;;  %p2014_p8 = scmp.ne.s32.totalorder %s1375_s14, %s2013_s15  ;;  %p2019_p10 = scmp.lt.s32.totalorder %s2013_s15, %s2013_s15 }
 0x23b   :  { %v1894_v48 = vpop.eup %1893  ;;  %v884_v57 = vpop.f32.mrb[84].mxu1  ;;  %v999_v43 = vpack.c.bf16 %v1892_v44, %v1888_v37 }
 0x23c   :  { %v885_v59 = vadd.f32 %v884_v57, %v2410_v14  ;;  %v886_v60 = vpop.f32.mrb[85].mxu1  ;;  %v1000_v54 = vpack.c.bf16 %v1894_v48, %v1890_v38  ;;  %p2020_p11 = por %p2019_p10, %p2018_p9 }
 0x23d   :  { %v887_v61 = vadd.f32 %v886_v60, %v2414_v17  ;;  %v888_v0 = vpop.f32.mrb[86].mxu1 }
 0x23e   :  { %1903 = vtanh.f32 %v885_v59  ;;  %v889_v42 = vadd.f32 %v888_v0, %v2410_v14  ;;  %v890_v46 = vpop.f32.mrb[87].mxu1  ;;  %1264 = vmatprep.mubr.bf16.mxu0 %v1000_v54  ;;  %p2021_p12 = pnand %p2020_p11, %p2014_p8 }
 0x23f   :  { %1905 = vtanh.f32 %v887_v61  ;;  %v891_v3 = vadd.f32 %v890_v46, %v2414_v17  ;;  %1265 = vmatmul.mubr.bf16.gmra.mrb[76].mxu0 %v999_v43 }
 0x240   :  { %v1896_v9 = vpop.eup %1895  ;;  %1907 = vtanh.f32 %v889_v42 }
 0x241   :  { %v1898_v13 = vpop.eup %1897  ;;  %1909 = vtanh.f32 %v891_v3 }
 0x242   :  { %v1900_v19 = vpop.eup %1899 }
 0x243   :  { %v1902_v34 = vpop.eup %1901  ;;  %v894_v40 = vpop.f32.mrb[88].mxu1  ;;  %v1001_v45 = vpack.c.bf16 %v1900_v19, %v1896_v9 }
 0x244   :  { %v895_v47 = vadd.f32 %v894_v40, %v2410_v14  ;;  %v896_v50 = vpop.f32.mrb[89].mxu1  ;;  %v1002_v51 = vpack.c.bf16 %v1902_v34, %v1898_v13 }
 0x245   :  { %v897_v6 = vadd.f32 %v896_v50, %v2414_v17  ;;  %v898_v53 = vpop.f32.mrb[90].mxu1 }
 0x246   :  { %1911 = vtanh.f32 %v895_v47  ;;  %v899_v52 = vadd.f32 %v898_v53, %v2410_v14  ;;  %v900_v55 = vpop.f32.mrb[91].mxu1  ;;  %1272 = vmatprep.mubr.bf16.mxu0 %v1002_v51 }
 0x247   :  { %1913 = vtanh.f32 %v897_v6  ;;  %v901_v15 = vadd.f32 %v900_v55, %v2414_v17  ;;  %1273 = vmatmul.mubr.bf16.gmra.mrb[80].mxu0 %v1001_v45 }
 0x248   :  { %v1904_v21 = vpop.eup %1903  ;;  %1915 = vtanh.f32 %v899_v52 }
 0x249   :  { %v1906_v22 = vpop.eup %1905  ;;  %1917 = vtanh.f32 %v901_v15 }
 0x24a   :  { %v1908_v25 = vpop.eup %1907 }
 0x24b   :  { %v1910_v26 = vpop.eup %1909  ;;  %v904_v41 = vpop.f32.mrb[92].mxu1  ;;  %v1003_v58 = vpack.c.bf16 %v1908_v25, %v1904_v21 }
 0x24c   :  { %v905_v62 = vadd.f32 %v904_v41, %v2410_v14  ;;  %v906_v63 = vpop.f32.mrb[93].mxu1  ;;  %v1004_v2 = vpack.c.bf16 %v1910_v26, %v1906_v22 }
 0x24d   :  { %v907_v28 = vadd.f32 %v906_v63, %v2414_v17  ;;  %v908_v39 = vpop.f32.mrb[94].mxu1 }
 0x24e   :  { %1919 = vtanh.f32 %v905_v62  ;;  %v909_v49 = vadd.f32 %v908_v39, %v2410_v14  ;;  %v910_v1 = vpop.f32.mrb[95].mxu1  ;;  %1280 = vmatprep.mubr.bf16.mxu0 %v1004_v2 }
 0x24f   :  { %1921 = vtanh.f32 %v907_v28  ;;  %v911_v5 = vadd.f32 %v910_v1, %v2414_v17  ;;  %1281 = vmatmul.mubr.bf16.gmra.mrb[84].mxu0 %v1003_v58 }
 0x250   :  { %v1912_v7 = vpop.eup %1911  ;;  %1923 = vtanh.f32 %v909_v49 }
 0x251   :  { %v1914_v8 = vpop.eup %1913  ;;  %1925 = vtanh.f32 %v911_v5 }
 0x252   :  { %v1916_v10 = vpop.eup %1915 }
 0x253   :  { %v1918_v4 = vpop.eup %1917  ;;  %v1005_v11 = vpack.c.bf16 %v1916_v10, %v1912_v7 }
 0x254   :  { %v1006_v12 = vpack.c.bf16 %v1918_v4, %v1914_v8 }
 0x256   :  { %1288 = vmatprep.mubr.bf16.mxu0 %v1006_v12 }
 0x257   :  { %1289 = vmatmul.mubr.bf16.gmra.mrb[88].mxu0 %v1005_v11 }
 0x258   :  { %v1920_v16 = vpop.eup %1919 }
 0x259   :  { %v1922_v18 = vpop.eup %1921 }
 0x25a   :  { %v1924_v20 = vpop.eup %1923 }
 0x25b   :  { %v1926_v14 = vpop.eup %1925  ;;  %v1007_v23 = vpack.c.bf16 %v1924_v20, %v1920_v16 }
 0x25c   :  { %v1008_v24 = vpack.c.bf16 %v1926_v14, %v1922_v18 }
 0x25e   :  { %1296 = vmatprep.mubr.bf16.mxu0 %v1008_v24 }
 0x25f   :  { %1297 = vmatmul.mubr.bf16.gmra.mrb[92].mxu0 %v1007_v23 }
 0x2ba   :  { %v1485_v17 = vpop.f32.mrb[32].mxu0 }
 0x2bb   :  { %v1486_v29 = vpop.f32.mrb[33].mxu0 }
 0x2bc   :  { %v1487_v30 = vadd.f32 %v1486_v29, %v1485_v17  ;;  %v1488_v31 = vpop.f32.mrb[34].mxu0 }
 0x2bd   :  { %v1489_v32 = vpop.f32.mrb[35].mxu0 }
 0x2be   :  { %v1179_v33 = vadd.f32 %v1487_v30, %v2483_v27  ;;  %v1490_v35 = vadd.f32 %v1489_v32, %v1488_v31 }
 0x2c0   :  { %1927 = vtanh.f32 %v1179_v33  ;;  %v1182_v36 = vadd.f32 %v1490_v35, %v2483_v27 }
 0x2c2   :  { %1929 = vtanh.f32 %v1182_v36  ;;  %v1491_v56 = vpop.f32.mrb[36].mxu0 }
 0x2c3   :  { %v1492_v37 = vpop.f32.mrb[37].mxu0 }
 0x2c4   :  { %v1493_v38 = vadd.f32 %v1492_v37, %v1491_v56  ;;  %v1494_v44 = vpop.f32.mrb[38].mxu0 }
 0x2c5   :  { %v1495_v48 = vpop.f32.mrb[39].mxu0 }
 0x2c6   :  { %v1187_v57 = vadd.f32 %v1493_v38, %v2483_v27  ;;  %v1496_v43 = vadd.f32 %v1495_v48, %v1494_v44 }
 0x2c8   :  { %1931 = vtanh.f32 %v1187_v57  ;;  %v1190_v59 = vadd.f32 %v1496_v43, %v2483_v27 }
 0x2ca   :  { %v1928_v60 = vpop.eup %1927  ;;  %1933 = vtanh.f32 %v1190_v59  ;;  %v1497_v54 = vpop.f32.mrb[40].mxu0 }
 0x2cb   :  { %1337 = vst [vmem:[#allocation5] sm:$0xff] %v1928_v60  ;;  %v1498_v61 = vpop.f32.mrb[41].mxu0 }
 0x2cc   :  { %v1930_v0 = vpop.eup %1929  ;;  %v1499_v42 = vadd.f32 %v1498_v61, %v1497_v54  ;;  %v1500_v46 = vpop.f32.mrb[42].mxu0 }
 0x2cd   :  { %1338 = vst [vmem:[#allocation5 + $0x8] sm:$0xff] %v1930_v0  ;;  %v1501_v3 = vpop.f32.mrb[43].mxu0 }
 0x2ce   :  { %v1195_v9 = vadd.f32 %v1499_v42, %v2483_v27  ;;  %v1502_v13 = vadd.f32 %v1501_v3, %v1500_v46 }
 0x2d0   :  { %1935 = vtanh.f32 %v1195_v9  ;;  %v1198_v19 = vadd.f32 %v1502_v13, %v2483_v27 }
 0x2d2   :  { %v1932_v34 = vpop.eup %1931  ;;  %1937 = vtanh.f32 %v1198_v19  ;;  %v1503_v40 = vpop.f32.mrb[44].mxu0 }
 0x2d3   :  { %1339 = vst [vmem:[#allocation5 + $0x10] sm:$0xff] %v1932_v34  ;;  %v1504_v45 = vpop.f32.mrb[45].mxu0 }
 0x2d4   :  { %v1934_v47 = vpop.eup %1933  ;;  %v1505_v50 = vadd.f32 %v1504_v45, %v1503_v40  ;;  %v1506_v51 = vpop.f32.mrb[46].mxu0 }
 0x2d5   :  { %1340 = vst [vmem:[#allocation5 + $0x18] sm:$0xff] %v1934_v47  ;;  %v1507_v6 = vpop.f32.mrb[47].mxu0 }
 0x2d6   :  { %v1203_v53 = vadd.f32 %v1505_v50, %v2483_v27  ;;  %v1508_v52 = vadd.f32 %v1507_v6, %v1506_v51 }
 0x2d8   :  { %1939 = vtanh.f32 %v1203_v53  ;;  %v1206_v55 = vadd.f32 %v1508_v52, %v2483_v27 }
 0x2da   :  { %v1936_v15 = vpop.eup %1935  ;;  %1941 = vtanh.f32 %v1206_v55  ;;  %v1509_v21 = vpop.f32.mrb[48].mxu0 }
 0x2db   :  { %1341 = vst [vmem:[#allocation5 + $0x20] sm:$0xff] %v1936_v15  ;;  %v1510_v22 = vpop.f32.mrb[49].mxu0 }
 0x2dc   :  { %v1938_v25 = vpop.eup %1937  ;;  %v1511_v26 = vadd.f32 %v1510_v22, %v1509_v21  ;;  %v1512_v41 = vpop.f32.mrb[50].mxu0 }
 0x2dd   :  { %1342 = vst [vmem:[#allocation5 + $0x28] sm:$0xff] %v1938_v25  ;;  %v1513_v58 = vpop.f32.mrb[51].mxu0 }
 0x2de   :  { %v1211_v62 = vadd.f32 %v1511_v26, %v2483_v27  ;;  %v1514_v63 = vadd.f32 %v1513_v58, %v1512_v41 }
 0x2e0   :  { %1943 = vtanh.f32 %v1211_v62  ;;  %v1214_v2 = vadd.f32 %v1514_v63, %v2483_v27 }
 0x2e2   :  { %v1940_v28 = vpop.eup %1939  ;;  %1945 = vtanh.f32 %v1214_v2  ;;  %v1515_v39 = vpop.f32.mrb[52].mxu0 }
 0x2e3   :  { %1343 = vst [vmem:[#allocation5 + $0x30] sm:$0xff] %v1940_v28  ;;  %v1516_v49 = vpop.f32.mrb[53].mxu0 }
 0x2e4   :  { %v1942_v1 = vpop.eup %1941  ;;  %v1517_v5 = vadd.f32 %v1516_v49, %v1515_v39  ;;  %v1518_v7 = vpop.f32.mrb[54].mxu0 }
 0x2e5   :  { %1344 = vst [vmem:[#allocation5 + $0x38] sm:$0xff] %v1942_v1  ;;  %v1519_v8 = vpop.f32.mrb[55].mxu0 }
 0x2e6   :  { %v1219_v10 = vadd.f32 %v1517_v5, %v2483_v27  ;;  %v1520_v4 = vadd.f32 %v1519_v8, %v1518_v7 }
 0x2e8   :  { %1947 = vtanh.f32 %v1219_v10  ;;  %v1222_v11 = vadd.f32 %v1520_v4, %v2483_v27 }
 0x2ea   :  { %v1944_v12 = vpop.eup %1943  ;;  %1949 = vtanh.f32 %v1222_v11  ;;  %v1521_v16 = vpop.f32.mrb[56].mxu0 }
 0x2eb   :  { %1345 = vst [vmem:[#allocation5 + $0x40] sm:$0xff] %v1944_v12  ;;  %v1522_v18 = vpop.f32.mrb[57].mxu0 }
 0x2ec   :  { %v1946_v20 = vpop.eup %1945  ;;  %v1523_v14 = vadd.f32 %v1522_v18, %v1521_v16  ;;  %v1524_v23 = vpop.f32.mrb[58].mxu0 }
 0x2ed   :  { %1346 = vst [vmem:[#allocation5 + $0x48] sm:$0xff] %v1946_v20  ;;  %v1525_v24 = vpop.f32.mrb[59].mxu0 }
 0x2ee   :  { %v1227_v17 = vadd.f32 %v1523_v14, %v2483_v27  ;;  %v1526_v29 = vadd.f32 %v1525_v24, %v1524_v23 }
 0x2f0   :  { %1951 = vtanh.f32 %v1227_v17  ;;  %v1230_v30 = vadd.f32 %v1526_v29, %v2483_v27 }
 0x2f2   :  { %v1948_v31 = vpop.eup %1947  ;;  %1953 = vtanh.f32 %v1230_v30  ;;  %v1527_v32 = vpop.f32.mrb[60].mxu0 }
 0x2f3   :  { %1347 = vst [vmem:[#allocation5 + $0x50] sm:$0xff] %v1948_v31  ;;  %v1528_v33 = vpop.f32.mrb[61].mxu0 }
 0x2f4   :  { %v1950_v35 = vpop.eup %1949  ;;  %v1529_v36 = vadd.f32 %v1528_v33, %v1527_v32  ;;  %v1530_v56 = vpop.f32.mrb[62].mxu0 }
 0x2f5   :  { %1348 = vst [vmem:[#allocation5 + $0x58] sm:$0xff] %v1950_v35  ;;  %v1531_v37 = vpop.f32.mrb[63].mxu0 }
 0x2f6   :  { %v1235_v38 = vadd.f32 %v1529_v36, %v2483_v27  ;;  %v1532_v44 = vadd.f32 %v1531_v37, %v1530_v56 }
 0x2f8   :  { %1955 = vtanh.f32 %v1235_v38  ;;  %v1238_v48 = vadd.f32 %v1532_v44, %v2483_v27 }
 0x2fa   :  { %v1952_v57 = vpop.eup %1951  ;;  %1957 = vtanh.f32 %v1238_v48  ;;  %v1533_v43 = vpop.f32.mrb[64].mxu0 }
 0x2fb   :  { %1349 = vst [vmem:[#allocation5 + $0x60] sm:$0xff] %v1952_v57  ;;  %v1534_v59 = vpop.f32.mrb[65].mxu0 }
 0x2fc   :  { %v1954_v60 = vpop.eup %1953  ;;  %v1535_v54 = vadd.f32 %v1534_v59, %v1533_v43  ;;  %v1536_v61 = vpop.f32.mrb[66].mxu0 }
 0x2fd   :  { %1350 = vst [vmem:[#allocation5 + $0x68] sm:$0xff] %v1954_v60  ;;  %v1537_v0 = vpop.f32.mrb[67].mxu0 }
 0x2fe   :  { %v1243_v42 = vadd.f32 %v1535_v54, %v2483_v27  ;;  %v1538_v46 = vadd.f32 %v1537_v0, %v1536_v61 }
 0x300   :  { %1959 = vtanh.f32 %v1243_v42  ;;  %v1246_v3 = vadd.f32 %v1538_v46, %v2483_v27 }
 0x302   :  { %v1956_v9 = vpop.eup %1955  ;;  %1961 = vtanh.f32 %v1246_v3  ;;  %v1539_v13 = vpop.f32.mrb[68].mxu0 }
 0x303   :  { %1351 = vst [vmem:[#allocation5 + $0x70] sm:$0xff] %v1956_v9  ;;  %v1540_v19 = vpop.f32.mrb[69].mxu0 }
 0x304   :  { %v1958_v34 = vpop.eup %1957  ;;  %v1541_v40 = vadd.f32 %v1540_v19, %v1539_v13  ;;  %v1542_v45 = vpop.f32.mrb[70].mxu0 }
 0x305   :  { %1352 = vst [vmem:[#allocation5 + $0x78] sm:$0xff] %v1958_v34  ;;  %v1543_v47 = vpop.f32.mrb[71].mxu0 }
 0x306   :  { %v1251_v50 = vadd.f32 %v1541_v40, %v2483_v27  ;;  %v1544_v51 = vadd.f32 %v1543_v47, %v1542_v45 }
 0x308   :  { %1963 = vtanh.f32 %v1251_v50  ;;  %v1254_v6 = vadd.f32 %v1544_v51, %v2483_v27 }
 0x30a   :  { %v1960_v53 = vpop.eup %1959  ;;  %1965 = vtanh.f32 %v1254_v6  ;;  %v1545_v52 = vpop.f32.mrb[72].mxu0 }
 0x30b   :  { %1353 = vst [vmem:[#allocation5 + $0x80] sm:$0xff] %v1960_v53  ;;  %v1546_v55 = vpop.f32.mrb[73].mxu0 }
 0x30c   :  { %v1962_v15 = vpop.eup %1961  ;;  %v1547_v21 = vadd.f32 %v1546_v55, %v1545_v52  ;;  %v1548_v22 = vpop.f32.mrb[74].mxu0 }
 0x30d   :  { %1354 = vst [vmem:[#allocation5 + $0x88] sm:$0xff] %v1962_v15  ;;  %v1549_v25 = vpop.f32.mrb[75].mxu0 }
 0x30e   :  { %v1259_v26 = vadd.f32 %v1547_v21, %v2483_v27  ;;  %v1550_v41 = vadd.f32 %v1549_v25, %v1548_v22 }
 0x310   :  { %1967 = vtanh.f32 %v1259_v26  ;;  %v1262_v58 = vadd.f32 %v1550_v41, %v2483_v27 }
 0x312   :  { %v1964_v62 = vpop.eup %1963  ;;  %1969 = vtanh.f32 %v1262_v58  ;;  %v1551_v63 = vpop.f32.mrb[76].mxu0 }
 0x313   :  { %1355 = vst [vmem:[#allocation5 + $0x90] sm:$0xff] %v1964_v62  ;;  %v1552_v2 = vpop.f32.mrb[77].mxu0 }
 0x314   :  { %v1966_v28 = vpop.eup %1965  ;;  %v1553_v39 = vadd.f32 %v1552_v2, %v1551_v63  ;;  %v1554_v49 = vpop.f32.mrb[78].mxu0 }
 0x315   :  { %1356 = vst [vmem:[#allocation5 + $0x98] sm:$0xff] %v1966_v28  ;;  %v1555_v1 = vpop.f32.mrb[79].mxu0 }
 0x316   :  { %v1267_v5 = vadd.f32 %v1553_v39, %v2483_v27  ;;  %v1556_v7 = vadd.f32 %v1555_v1, %v1554_v49 }
 0x318   :  { %1971 = vtanh.f32 %v1267_v5  ;;  %v1270_v8 = vadd.f32 %v1556_v7, %v2483_v27 }
 0x31a   :  { %v1968_v10 = vpop.eup %1967  ;;  %1973 = vtanh.f32 %v1270_v8  ;;  %v1557_v4 = vpop.f32.mrb[80].mxu0 }
 0x31b   :  { %1357 = vst [vmem:[#allocation5 + $0xa0] sm:$0xff] %v1968_v10  ;;  %v1558_v11 = vpop.f32.mrb[81].mxu0 }
 0x31c   :  { %v1970_v12 = vpop.eup %1969  ;;  %v1559_v16 = vadd.f32 %v1558_v11, %v1557_v4  ;;  %v1560_v18 = vpop.f32.mrb[82].mxu0 }
 0x31d   :  { %1358 = vst [vmem:[#allocation5 + $0xa8] sm:$0xff] %v1970_v12  ;;  %v1561_v20 = vpop.f32.mrb[83].mxu0 }
 0x31e   :  { %v1275_v14 = vadd.f32 %v1559_v16, %v2483_v27  ;;  %v1562_v23 = vadd.f32 %v1561_v20, %v1560_v18 }
 0x320   :  { %1975 = vtanh.f32 %v1275_v14  ;;  %v1278_v24 = vadd.f32 %v1562_v23, %v2483_v27 }
 0x322   :  { %v1972_v17 = vpop.eup %1971  ;;  %1977 = vtanh.f32 %v1278_v24  ;;  %v1563_v29 = vpop.f32.mrb[84].mxu0 }
 0x323   :  { %1359 = vst [vmem:[#allocation5 + $0xb0] sm:$0xff] %v1972_v17  ;;  %v1564_v30 = vpop.f32.mrb[85].mxu0 }
 0x324   :  { %v1974_v31 = vpop.eup %1973  ;;  %v1565_v32 = vadd.f32 %v1564_v30, %v1563_v29  ;;  %v1566_v33 = vpop.f32.mrb[86].mxu0 }
 0x325   :  { %1360 = vst [vmem:[#allocation5 + $0xb8] sm:$0xff] %v1974_v31  ;;  %v1567_v35 = vpop.f32.mrb[87].mxu0 }
 0x326   :  { %v1283_v36 = vadd.f32 %v1565_v32, %v2483_v27  ;;  %v1568_v56 = vadd.f32 %v1567_v35, %v1566_v33 }
 0x328   :  { %1979 = vtanh.f32 %v1283_v36  ;;  %v1286_v37 = vadd.f32 %v1568_v56, %v2483_v27 }
 0x32a   :  { %v1976_v38 = vpop.eup %1975  ;;  %1981 = vtanh.f32 %v1286_v37  ;;  %v1569_v44 = vpop.f32.mrb[88].mxu0 }
 0x32b   :  { %1361 = vst [vmem:[#allocation5 + $0xc0] sm:$0xff] %v1976_v38  ;;  %v1570_v48 = vpop.f32.mrb[89].mxu0 }
 0x32c   :  { %v1978_v57 = vpop.eup %1977  ;;  %v1571_v43 = vadd.f32 %v1570_v48, %v1569_v44  ;;  %v1572_v59 = vpop.f32.mrb[90].mxu0 }
 0x32d   :  { %1362 = vst [vmem:[#allocation5 + $0xc8] sm:$0xff] %v1978_v57  ;;  %v1573_v60 = vpop.f32.mrb[91].mxu0 }
 0x32e   :  { %v1291_v54 = vadd.f32 %v1571_v43, %v2483_v27  ;;  %v1574_v61 = vadd.f32 %v1573_v60, %v1572_v59 }
 0x330   :  { %1983 = vtanh.f32 %v1291_v54  ;;  %v1294_v0 = vadd.f32 %v1574_v61, %v2483_v27 }
 0x332   :  { %v1980_v42 = vpop.eup %1979  ;;  %1985 = vtanh.f32 %v1294_v0  ;;  %v1575_v46 = vpop.f32.mrb[92].mxu0 }
 0x333   :  { %1363 = vst [vmem:[#allocation5 + $0xd0] sm:$0xff] %v1980_v42  ;;  %v1576_v3 = vpop.f32.mrb[93].mxu0 }
 0x334   :  { %v1982_v9 = vpop.eup %1981  ;;  %v1577_v13 = vadd.f32 %v1576_v3, %v1575_v46  ;;  %v1578_v19 = vpop.f32.mrb[94].mxu0 }
 0x335   :  { %1364 = vst [vmem:[#allocation5 + $0xd8] sm:$0xff] %v1982_v9  ;;  %v1579_v34 = vpop.f32.mrb[95].mxu0 }
 0x336   :  { %v1299_v40 = vadd.f32 %v1577_v13, %v2483_v27  ;;  %v1580_v45 = vadd.f32 %v1579_v34, %v1578_v19 }
 0x338   :  { %1987 = vtanh.f32 %v1299_v40  ;;  %v1302_v47 = vadd.f32 %v1580_v45, %v2483_v27 }
 0x33a   :  { %v1984_v50 = vpop.eup %1983  ;;  %1989 = vtanh.f32 %v1302_v47 }
 0x33b   :  { %1365 = vst [vmem:[#allocation5 + $0xe0] sm:$0xff] %v1984_v50 }
 0x33c   :  { %v1986_v51 = vpop.eup %1985 }
 0x33d   :  { %1366 = vst [vmem:[#allocation5 + $0xe8] sm:$0xff] %v1986_v51 }
 0x342   :  { %v1988_v6 = vpop.eup %1987 }
 0x343   :  { %1367 = vst [vmem:[#allocation5 + $0xf0] sm:$0xff] %v1988_v6 }
 0x344   :  { %v1990_v53 = vpop.eup %1989 }
 0x345   :  { %1368 = vst [vmem:[#allocation5 + $0xf8] sm:$0xff] %v1990_v53 }
 0x346   :  { %2024 = shalt.err (!%p2021_p12)
}
 0x347   :  { %s2025_s18 = scalar_lea.hbm %s2539_s7, 4096 }
 0x348   :  { %p2026_p13 = scmp.ne.s32.totalorder %s2539_s7, %s2025_s18  ;;  %p2029_p0 = scmp.lt.u32.totalorder %s2025_s18, %s2539_s7 }
 0x34a   :  { %p2031_p1 = pnand %p2029_p0, %p2026_p13 }
 0x34c   :  { %2034 = shalt.err (!%p2031_p1)
}
 0x34d   :  { %1380 = dma.vmem_to_hbm [thread:$0]  %s1375_s14, 4096, %s2539_s7, [#allocation4], %s2040_s11, %s2040_s11, %s2041_s12  }
 0x34e   :  { %2037 = dma.done.wait [#allocation4], 4096  }
 0x34f   :  { %2038 = vsyncadd [#allocation4], 4294963200 }
 0x350   :  { %1384 = vsyncpa [#allocation3], 1 }
 0x351   :  { %1385 = vsyncpa [#allocation4], 1 }

</bundles_post_ra>
